<compile_context>
chip_gen: v5e
topology: v5e:2x2
jax: 0.10.0
libtpu: 0.0.40
codegen_flags: <defaults>
</compile_context>

<pallas_src>
import numpy as np
import jax
import jax.numpy as jnp
from jax.experimental import pallas as pl
from jax.experimental.pallas import tpu as pltpu

EPS = 1e-5
VMEM_LIMIT = 40 * 1024 * 1024  # safe on v5e/v6e (128 MiB) and v7x (64 MiB)


# ---------------------------------------------------------------------------
# FC + fused BatchNorm1d + ReLU
# ---------------------------------------------------------------------------
def fc_bn_relu(z, fc, tile_f=2048):
    """y = relu(batchnorm(z @ W + b)).  Batch stats computed in-kernel."""
    B, D = z.shape
    F = fc["w"].shape[1]
    assert F % tile_f == 0

    def kernel(z_ref, w_ref, b_ref, g_ref, bt_ref, o_ref):
        y = jnp.dot(z_ref[...], w_ref[...],
                    preferred_element_type=jnp.float32) + b_ref[...]
        mean = jnp.mean(y, axis=0, keepdims=True)
        var = jnp.mean(jnp.square(y - mean), axis=0, keepdims=True)
        scale = g_ref[...] * jax.lax.rsqrt(var + EPS)
        o_ref[...] = jnp.maximum((y - mean) * scale + bt_ref[...],
                                 0.0).astype(o_ref.dtype)

    return pl.pallas_call(
        kernel,
        out_shape=jax.ShapeDtypeStruct((B, F), jnp.bfloat16),
        grid=(F // tile_f,),
        in_specs=[
            pl.BlockSpec((B, D), lambda i: (0, 0)),
            pl.BlockSpec((D, tile_f), lambda i: (0, i)),
            pl.BlockSpec((1, tile_f), lambda i: (0, i)),
            pl.BlockSpec((1, tile_f), lambda i: (0, i)),
            pl.BlockSpec((1, tile_f), lambda i: (0, i)),
        ],
        out_specs=pl.BlockSpec((B, tile_f), lambda i: (0, i)),
        compiler_params=pltpu.CompilerParams(
            dimension_semantics=("parallel",),
            vmem_limit_bytes=VMEM_LIMIT),
    )(z.astype(jnp.bfloat16), fc["w"], fc["b"].reshape(1, F),
      fc["gamma"].reshape(1, F), fc["beta"].reshape(1, F))


# ---------------------------------------------------------------------------
# Weight pre-arrangement (host-side, one time)
# ---------------------------------------------------------------------------
def build_convt_params(w_t, b, stride, pad, tile_co):
    """Phase-decompose a ConvTranspose2d weight (Cin,Cout,K,K layout).

    Produces wcat[ph, mh, dwi] of shape (Cin, s*tile_co) per Cout tile, where
    the last dim is (w-phase, co) so that all W-phases come out of one matmul.
    """
    w_t = np.asarray(w_t, np.float32)
    b = np.asarray(b, np.float32)
    Cin, Cout, K, _ = w_t.shape
    s = stride
    assert Cout % tile_co == 0
    n_co = Cout // tile_co

    rho = [(ph + pad) % s for ph in range(s)]
    c0 = [(ph + pad - rho[ph]) // s for ph in range(s)]
    taps = [sum(1 for t in range(K) if s * t + rho[ph] < K) for ph in range(s)]
    T = taps[0]
    assert all(t == T for t in taps), "uneven tap count not supported"
    pad_in = max(0, -(min(c0[ph] - T + 1 for ph in range(s))))
    base = tuple(c0[ph] - T + 1 + pad_in for ph in range(s))
    dws = tuple(sorted({base[pw] + mw for pw in range(s) for mw in range(T)}))

    wcat = np.zeros((s, T, len(dws), Cin, n_co, s, tile_co), np.float32)
    for ph in range(s):
        for mh in range(T):
            kh = s * (T - 1 - mh) + rho[ph]
            for dwi, dw in enumerate(dws):
                for pw in range(s):
                    mw = dw - base[pw]
                    if 0 <= mw < T:
                        kw = s * (T - 1 - mw) + rho[pw]
                        wcat[ph, mh, dwi, :, :, pw, :] = (
                            w_t[:, :, kh, kw].reshape(Cin, n_co, tile_co))
    wcat = wcat.reshape(s, T, len(dws), Cin, n_co * s * tile_co)
    bias = np.broadcast_to(b.reshape(n_co, 1, tile_co),
                           (n_co, s, tile_co)).reshape(1, n_co * s * tile_co)
    return dict(wcat=jnp.asarray(wcat, jnp.bfloat16),
                bias=jnp.asarray(bias, jnp.float32),
                s=s, T=T, dws=dws, base=base, pad_in=pad_in,
                tile_co=tile_co, n_co=n_co, cin=Cin)


def build_conv_params(w_t, b, pad, tile_co, cout_pad=None):
    """Regular Conv2d weight (Cout,Cin,K,K layout), optional Cout zero-pad."""
    w_t = np.asarray(w_t, np.float32)
    b = np.asarray(b, np.float32)
    Cout, Cin, K, _ = w_t.shape
    Cp = Cout if cout_pad is None else cout_pad
    assert Cp % tile_co == 0 and Cp >= Cout
    n_co = Cp // tile_co

    w_hwio = np.zeros((K, K, Cin, Cp), np.float32)
    w_hwio[:, :, :, :Cout] = np.transpose(w_t, (2, 3, 1, 0))
    wcat = np.zeros((1, K, K, Cin, n_co, 1, tile_co), np.float32)
    for mh in range(K):
        for dw in range(K):
            wcat[0, mh, dw, :, :, 0, :] = w_hwio[mh, dw].reshape(
                Cin, n_co, tile_co)
    wcat = wcat.reshape(1, K, K, Cin, n_co * tile_co)
    bias = np.zeros((1, n_co * tile_co), np.float32)
    bias[0, :Cout] = b
    return dict(wcat=jnp.asarray(wcat, jnp.bfloat16),
                bias=jnp.asarray(bias, jnp.float32),
                s=1, T=K, dws=tuple(range(K)), base=(0,), pad_in=pad,
                tile_co=tile_co, n_co=n_co, cin=Cin)


# ---------------------------------------------------------------------------
# Generic conv / transposed-conv layer kernel
#   input:  raw (pre-BN) activation, padded by pad_in, NHWC, bf16
#   fused:  per-channel scale/shift + ReLU on the input, optional tanh output
#   output: raw conv output (bf16) + per-channel (sum, sumsq) for the next BN
# ---------------------------------------------------------------------------
def conv_layer(xp, scale, shift, p, tq, act="none", out_dtype=jnp.bfloat16):
    B, Hp, Wp, Cin = xp.shape
    s, T = p["s"], p["T"]
    dws, base = p["dws"], p["base"]
    tile_co, n_co = p["tile_co"], p["n_co"]
    pad_in = p["pad_in"]
    assert Cin == p["cin"]

    max_dh = max(base) + T - 1
    max_dw = max(dws)
    Hq = Hp - max_dh                 # output rows per H-phase
    Wq = Wp - max_dw                 # output cols per W-phase
    assert Hq % tq == 0
    n_h = Hq // tq
    Wout = s * Wq
    Cout = n_co * tile_co
    band_h = tq + max_dh
    h_in = Hp - 2 * pad_in
    w_in = Wp - 2 * pad_in
    n_dw = len(dws)

    def kernel(x_ref, w_ref, b_ref, sc_ref, sh_ref, o_ref, st_ref):
        i = pl.program_id(2)
        q0 = pl.multiple_of(i * tq, tq)
        # Row band of the resident padded input; fused input-side BN + ReLU.
        band = x_ref[0, pl.ds(q0, band_h), :, :].astype(jnp.float32)
        band = jnp.maximum(band * sc_ref[...] + sh_ref[...], 0.0)
        if pad_in > 0:
            # zero-padding applies to the *normalized* activation
            row = q0 + jax.lax.broadcasted_iota(jnp.int32, (band_h, Wp), 0)
            col = jax.lax.broadcasted_iota(jnp.int32, (band_h, Wp), 1)
            valid = ((row >= pad_in) & (row < pad_in + h_in)
                     & (col >= pad_in) & (col < pad_in + w_in))
            band = jnp.where(valid[:, :, None], band, 0.0)
        band = band.astype(jnp.bfloat16)

        ch_sum = jnp.zeros((1, tile_co), jnp.float32)
        ch_sq = jnp.zeros((1, tile_co), jnp.float32)
        for ph in range(s):                       # H-phases
            acc = jnp.zeros((tq * Wq, s * tile_co), jnp.float32)
            for mh in range(T):                   # taps along H
                dh = base[ph] + mh
                for dwi in range(n_dw):           # column offsets
                    dw = dws[dwi]
                    lhs = band[dh:dh + tq, dw:dw + Wq, :].reshape(tq * Wq, Cin)
                    acc = acc + jnp.dot(lhs, w_ref[ph, mh, dwi],
                                        preferred_element_type=jnp.float32)
            # last dim of acc is (w-phase, co) -> free reshape interleaves W
            y = (acc + b_ref[...]).reshape(tq, Wout, tile_co)
            if act == "tanh":
                y = jnp.tanh(y)
            o_ref[0, :, ph:ph + 1, :, :] = (
                y.reshape(tq, 1, Wout, tile_co).astype(o_ref.dtype))
            yf = y.reshape(tq * Wout, tile_co)
            ch_sum = ch_sum + jnp.sum(yf, axis=0, keepdims=True)
            ch_sq = ch_sq + jnp.sum(yf * yf, axis=0, keepdims=True)
        st_ref[0, 0, 0:1, :] = ch_sum
        st_ref[0, 0, 1:2, :] = ch_sq

    out, stats = pl.pallas_call(
        kernel,
        out_shape=(
            jax.ShapeDtypeStruct((B, Hq, s, Wout, Cout), out_dtype),
            jax.ShapeDtypeStruct((B, n_h, 2, Cout), jnp.float32),
        ),
        grid=(n_co, B, n_h),   # Cout tile outermost -> weight stays resident
        in_specs=[
            pl.BlockSpec((1, Hp, Wp, Cin), lambda c, b, i: (b, 0, 0, 0)),
            pl.BlockSpec((s, T, n_dw, Cin, s * tile_co),
                         lambda c, b, i: (0, 0, 0, 0, c)),
            pl.BlockSpec((1, s * tile_co), lambda c, b, i: (0, c)),
            pl.BlockSpec((1, Cin), lambda c, b, i: (0, 0)),
            pl.BlockSpec((1, Cin), lambda c, b, i: (0, 0)),
        ],
        out_specs=(
            pl.BlockSpec((1, tq, s, Wout, tile_co),
                         lambda c, b, i: (b, i, 0, 0, c)),
            pl.BlockSpec((1, 1, 2, tile_co), lambda c, b, i: (b, i, 0, c)),
        ),
        compiler_params=pltpu.CompilerParams(
            dimension_semantics=("parallel", "parallel", "parallel"),
            vmem_limit_bytes=VMEM_LIMIT),
    )(xp, p["wcat"], p["bias"], scale.reshape(1, Cin), shift.reshape(1, Cin))

    # (B, Hq, s, Wout, Cout) -> (B, Hout, Wout, Cout): free row interleave
    return out.reshape(B, s * Hq, Wout, Cout), stats


def bn_scale_shift_from_stats(stats, n, gamma, beta):
    ch_sum = jnp.sum(stats[:, :, 0, :], axis=(0, 1))
    ch_sq = jnp.sum(stats[:, :, 1, :], axis=(0, 1))
    mean = ch_sum / n
    var = jnp.maximum(ch_sq / n - mean * mean, 0.0)   # clamp one-pass variance
    scale = gamma * jax.lax.rsqrt(var + EPS)
    shift = beta - mean * scale
    return scale, shift


# ---------------------------------------------------------------------------
# Parameters & forward
# ---------------------------------------------------------------------------
def init_params(key, latent_dim, channels):
    feat = 4 * 4 * 1024
    keys = jax.random.split(key, 32)
    it = iter(keys)

    def nrm(shape, s=0.05):
        return s * jax.random.normal(next(it), shape, jnp.float32)

    params = {"channels": channels}
    w_fc = nrm((feat, latent_dim))                 # torch nn.Linear (out, in)
    params["fc"] = dict(
        w=jnp.transpose(w_fc, (1, 0)).astype(jnp.bfloat16),
        b=nrm((feat,)),
        gamma=1.0 + nrm((feat,), 0.1),
        beta=nrm((feat,), 0.1),
    )

    # kind, Cin, Cout, K, stride, pad, tile_co, tq (phase rows per grid step)
    cfgs = [
        ("convT", 1024, 512, 4, 2, 1, 128, 4),
        ("convT", 512, 256, 4, 2, 1, 128, 8),
        ("convT", 256, 128, 4, 2, 1, 128, 16),
        ("convT", 128, 128, 4, 4, 0, 128, 8),
        ("convT", 128, 64, 4, 2, 1, 64, 16),
        ("conv", 64, 64, 5, 1, 2, 64, 16),
        ("conv", 64, channels, 3, 1, 1, 128, 16),  # Cout zero-padded to 128
    ]
    convs = []
    for li, (kind, cin, cout, k, st, pad, tco, tq) in enumerate(cfgs):
        last = li == len(cfgs) - 1
        if kind == "convT":
            w_t = nrm((cin, cout, k, k))           # torch ConvTranspose2d layout
            b = nrm((cout,))
            p = build_convt_params(w_t, b, st, pad, tco)
        else:
            w_t = nrm((cout, cin, k, k))           # torch Conv2d layout
            b = nrm((cout,))
            p = build_conv_params(w_t, b, pad, tco,
                                  cout_pad=128 if last else None)
        convs.append(dict(
            p=p, tq=tq,
            act="tanh" if last else "none",
            bn=None if last else (1.0 + nrm((cout,), 0.1), nrm((cout,), 0.1)),
        ))
    params["convs"] = convs
    return params


def generator_forward(z, params):
    # initial_fc: Linear -> BatchNorm1d -> ReLU, fully fused in one kernel
    fc = params["fc"]
    y = fc_bn_relu(z, fc)                               # (B, 16384) bf16
    # torch reshape(-1, 1024, 4, 4) (NCHW) -> NHWC
    x = jnp.transpose(y.reshape(-1, 1024, 4, 4), (0, 2, 3, 1))

    cin0 = x.shape[-1]
    scale = jnp.ones((cin0,), jnp.float32)              # FC BN already applied
    shift = jnp.zeros((cin0,), jnp.float32)

    for layer in params["convs"]:
        p = layer["p"]
        if p["pad_in"] > 0:
            pad = p["pad_in"]
            x = jnp.pad(x, ((0, 0), (pad, pad), (pad, pad), (0, 0)))
        x, stats = conv_layer(x, scale, shift, p, layer["tq"],
                              act=layer["act"])
        if layer["bn"] is not None:
            gamma, beta = layer["bn"]
            n = x.shape[0] * x.shape[1] * x.shape[2]
            scale, shift = bn_scale_shift_from_stats(stats, n, gamma, beta)

    channels = params["channels"]
    out = x[..., :channels].astype(jnp.float32)         # drop padded channels
    return jnp.transpose(out, (0, 3, 1, 2))             # NCHW like PyTorch


if __name__ == "__main__":
    latent_dim = 16
    output_dim = 3 * 256 * 256                           # -> channels = 3
    channels = output_dim // 256 ** 2
    batch = 2

    key = jax.random.PRNGKey(0)
    pkey, zkey = jax.random.split(key)
    params = init_params(pkey, latent_dim, channels)
    z = jax.random.normal(zkey, (batch, latent_dim), jnp.float32)

    out = generator_forward(z, params)
    out = jax.block_until_ready(out)

    assert out.shape == (batch, channels, 256, 256), out.shape
    assert bool(jnp.all(jnp.isfinite(out)))
    assert bool(jnp.all(jnp.abs(out) <= 1.0 + 1e-6))     # tanh output range
    print("KERNEL_OK")
</pallas_src>

<mosaic_0001>
module attributes {stable_mosaic.version = 11 : i64} {
  func.func @kernel(%arg0: i32, %arg1: memref<2x16xbf16, #tpu.memory_space<vmem>>, %arg2: memref<16x2048xbf16, #tpu.memory_space<vmem>>, %arg3: memref<1x2048xf32, #tpu.memory_space<vmem>>, %arg4: memref<1x2048xf32, #tpu.memory_space<vmem>>, %arg5: memref<1x2048xf32, #tpu.memory_space<vmem>>, %arg6: memref<2x2048xbf16, #tpu.memory_space<vmem>>) attributes {dimension_semantics = [#tpu.dimension_semantics<parallel>], iteration_bounds = array<i64: 8>, scalar_prefetch = 0 : i64, scratch_operands = 0 : i64, tpu.core_type = #tpu.core_type<tc>, window_params = [{pipeline_mode = #tpu.pipeline_mode<synchronous>, transform_indices = @transform_0, window_bounds = array<i64: 2, 16>}, {transform_indices = @transform_1, window_bounds = array<i64: 16, 2048>}, {transform_indices = @transform_2, window_bounds = array<i64: 1, 2048>}, {transform_indices = @transform_3, window_bounds = array<i64: 1, 2048>}, {transform_indices = @transform_4, window_bounds = array<i64: 1, 2048>}, {transform_indices = @transform_5, window_bounds = array<i64: 2, 2048>}]} {
    %c0 = arith.constant 0 : index
    %c0_0 = arith.constant 0 : index
    %0 = vector.load %arg1[%c0, %c0_0] : memref<2x16xbf16, #tpu.memory_space<vmem>>, vector<2x16xbf16>
    %c0_1 = arith.constant 0 : index
    %c0_2 = arith.constant 0 : index
    %1 = vector.load %arg2[%c0_1, %c0_2] : memref<16x2048xbf16, #tpu.memory_space<vmem>>, vector<16x2048xbf16>
    %cst = arith.constant dense<0.000000e+00> : vector<2x2048xf32>
    %2 = tpu.matmul %0, %1, %cst {dimension_numbers = #tpu.dot_dimension_numbers<[1], [0], [0], [1], [0, 0, 1, 1], [], []>} : vector<2x16xbf16>, vector<16x2048xbf16>, vector<2x2048xf32> -> vector<2x2048xf32>
    %c0_3 = arith.constant 0 : index
    %c0_4 = arith.constant 0 : index
    %3 = vector.load %arg3[%c0_3, %c0_4] : memref<1x2048xf32, #tpu.memory_space<vmem>>, vector<1x2048xf32>
    %4 = vector.broadcast %3 : vector<1x2048xf32> to vector<2x2048xf32>
    %5 = arith.addf %2, %4 : vector<2x2048xf32>
    %cst_5 = arith.constant dense<0.000000e+00> : vector<2048xf32>
    %6 = vector.multi_reduction <add>, %5, %cst_5 [0] : vector<2x2048xf32> to vector<2048xf32>
    %7 = vector.shape_cast %6 : vector<2048xf32> to vector<1x2048xf32>
    %cst_6 = arith.constant 2.000000e+00 : f32
    %8 = vector.broadcast %cst_6 : f32 to vector<1x2048xf32>
    %9 = arith.divf %7, %8 : vector<1x2048xf32>
    %10 = vector.broadcast %9 : vector<1x2048xf32> to vector<2x2048xf32>
    %11 = arith.subf %5, %10 : vector<2x2048xf32>
    %12 = arith.mulf %11, %11 : vector<2x2048xf32>
    %cst_7 = arith.constant dense<0.000000e+00> : vector<2048xf32>
    %13 = vector.multi_reduction <add>, %12, %cst_7 [0] : vector<2x2048xf32> to vector<2048xf32>
    %14 = vector.shape_cast %13 : vector<2048xf32> to vector<1x2048xf32>
    %cst_8 = arith.constant 2.000000e+00 : f32
    %15 = vector.broadcast %cst_8 : f32 to vector<1x2048xf32>
    %16 = arith.divf %14, %15 : vector<1x2048xf32>
    %c0_9 = arith.constant 0 : index
    %c0_10 = arith.constant 0 : index
    %17 = vector.load %arg4[%c0_9, %c0_10] : memref<1x2048xf32, #tpu.memory_space<vmem>>, vector<1x2048xf32>
    %cst_11 = arith.constant 9.99999974E-6 : f32
    %18 = vector.broadcast %cst_11 : f32 to vector<1x2048xf32>
    %19 = arith.addf %16, %18 : vector<1x2048xf32>
    %20 = math.rsqrt %19 : vector<1x2048xf32>
    %21 = arith.mulf %17, %20 : vector<1x2048xf32>
    %22 = vector.broadcast %9 : vector<1x2048xf32> to vector<2x2048xf32>
    %23 = arith.subf %5, %22 : vector<2x2048xf32>
    %24 = vector.broadcast %21 : vector<1x2048xf32> to vector<2x2048xf32>
    %25 = arith.mulf %23, %24 : vector<2x2048xf32>
    %c0_12 = arith.constant 0 : index
    %c0_13 = arith.constant 0 : index
    %26 = vector.load %arg5[%c0_12, %c0_13] : memref<1x2048xf32, #tpu.memory_space<vmem>>, vector<1x2048xf32>
    %27 = vector.broadcast %26 : vector<1x2048xf32> to vector<2x2048xf32>
    %28 = arith.addf %25, %27 : vector<2x2048xf32>
    %cst_14 = arith.constant 0.000000e+00 : f32
    %29 = vector.broadcast %cst_14 : f32 to vector<2x2048xf32>
    %30 = arith.maximumf %28, %29 : vector<2x2048xf32>
    %31 = arith.truncf %30 : vector<2x2048xf32> to vector<2x2048xbf16>
    %c0_15 = arith.constant 0 : index
    %c0_16 = arith.constant 0 : index
    %32 = vector.load %arg6[%c0_15, %c0_16] : memref<2x2048xbf16, #tpu.memory_space<vmem>>, vector<2x2048xbf16>
    tpu.vector_store %arg6[%c0_15, %c0_16], %31 {strides = array<i32>} : memref<2x2048xbf16, #tpu.memory_space<vmem>>, vector<2x2048xbf16>,
    return
  }
  func.func @transform_0(%arg0: i32) -> (i32, i32) {
    %c0_i32 = arith.constant 0 : i32
    %c0_i32_0 = arith.constant 0 : i32
    %c0_i32_1 = arith.constant 0 : i32
    return %c0_i32, %c0_i32_0 : i32, i32
  }
  func.func @transform_1(%arg0: i32) -> (i32, i32) {
    %c0_i32 = arith.constant 0 : i32
    %c0_i32_0 = arith.constant 0 : i32
    return %c0_i32, %arg0 : i32, i32
  }
  func.func @transform_2(%arg0: i32) -> (i32, i32) {
    %c0_i32 = arith.constant 0 : i32
    %c0_i32_0 = arith.constant 0 : i32
    return %c0_i32, %arg0 : i32, i32
  }
  func.func @transform_3(%arg0: i32) -> (i32, i32) {
    %c0_i32 = arith.constant 0 : i32
    %c0_i32_0 = arith.constant 0 : i32
    return %c0_i32, %arg0 : i32, i32
  }
  func.func @transform_4(%arg0: i32) -> (i32, i32) {
    %c0_i32 = arith.constant 0 : i32
    %c0_i32_0 = arith.constant 0 : i32
    return %c0_i32, %arg0 : i32, i32
  }
  func.func @transform_5(%arg0: i32) -> (i32, i32) {
    %c0_i32 = arith.constant 0 : i32
    %c0_i32_0 = arith.constant 0 : i32
    return %c0_i32, %arg0 : i32, i32
  }
}

</mosaic_0001>

<bundles_post_ra>
// kernel: tpu_custom_call.1
= control target key start
LH: loop header
LB: loop body
LE: loop exit
PB: predicated region body
PF: predicated region fallthrough
CT: control target
= control target key end

     0   :  { %s2884_s0 = inlined_call_operand.hbm [shape: bf16[2,16], index: 0, kind: input, shape index: {}]   ;;  %s2885_s1 = inlined_call_operand.hbm [shape: bf16[16,16384], index: 1, kind: input, shape index: {}]   ;;  %s2886_s2 = inlined_call_operand.hbm [shape: f32[1,16384], index: 2, kind: input, shape index: {}]   ;;  %s2887_s3 = inlined_call_operand.hbm [shape: f32[1,16384], index: 3, kind: input, shape index: {}]   ;;  %s2888_s4 = inlined_call_operand.hbm [shape: f32[1,16384], index: 4, kind: input, shape index: {}]   ;;  %s2889_s5 = inlined_call_operand.hbm [shape: bf16[2,16384], index: 5, kind: output, shape index: {}]  }
   0x1   :  { %2893 = sst [smem:[#allocation17_spill]] %s2884_s0 }
   0x2   :  { %2894 = sst [smem:[#allocation18_spill]] %s2885_s1 }
   0x3   :  { %2895 = sst [smem:[#allocation19_spill]] %s2887_s3 }
   0x4   :  { %10 = vsyncpa [#allocation3], 0 }
   0x5   :  { %11 = vsyncpa [#allocation6], 0 }
   0x6   :  { %13 = vsyncpa [#allocation6 + $0x1], 0 }
   0x7   :  { %14 = vsyncpa [#allocation9], 0 }
   0x8   :  { %16 = vsyncpa [#allocation9 + $0x1], 0 }
   0x9   :  { %17 = vsyncpa [#allocation4], 0 }
   0xa   :  { %19 = vsyncpa [#allocation4 + $0x1], 0  ;;  %s2085_s18 = smov 0   ;;  %s2087_s19 = smov 0  }
   0xb   :  { %s2089_s20 = smov 0   ;;  %s2091_s21 = smov 0  }
   0xc LB: > { %s2106_s22 = sadd.s32 1, %s2048_s21   ;;  %s53_s23 = sadd.s32 1, %s2044_s20  ;;  %s2048_s21 = sphi %s2091_s21, %s2921_s21   ;;  %s2044_s20 = sphi %s2089_s20, %s2920_s20   ;;  %s2040_s19 = sphi %s2087_s19, %s2919_s19   ;;  %s2036_s18 = sphi %s2085_s18, %s2918_s18  }
   0xd   : > { %s50_s24 = ssub.s32 %s2048_s21, %s2106_s22  ;;  %p60_p0 = scmp.ne.s32.totalorder %s2044_s20, %s2040_s19 }
   0xe   : > { %p51_p1 = scmp.eq.s32.totalorder %s50_s24, 0  ;;  %p61_p2 = scmp.eq.s32.totalorder %s2048_s21, 0 }
   0xf   : > { %p1750_p3 = scmp.lt.s32.totalorder %s2048_s21, 8  ;;  %s206_s26 = sand.u32 1, %s2048_s21  }
  0x10   : > { %s2116_s25 = scalar_select %p51_p1, %s2044_s20, %s53_s23  }
  0x11   : > { %p62_p4 = por %p61_p2, %p60_p0  ;;  %s208_s27 = sand.u32 1, %s2044_s20  }
  0x12   : > { %2896 = sst [smem:[#allocation16_spill]] %s2116_s25  ;;  %s1597_s28 = sshll.u32 %s208_s27, 7 }
  0x13   : > { %s1697_s29 = sshll.u32 %s2048_s21, 6  ;;  %s2897_s1 = sld [smem:[#allocation18_spill]] }
  0x14   : > { %s210_s9 = scalar_lea.vmem [#allocation5], %s1597_s28  ;;  %p2129_p5 = pnand %p1750_p3, %p62_p4 }
  0x15   : > { %s218_s10 = sshll.u32 %s210_s9, 4  ;;  %s2133_s12 = sshll.u32 %s208_s27, 4  ;;  %s219_s10 = int_to_ptr.vmem [resolvable:$true] %s218_s10 }
  0x16   : > { %s2137_s13 = scalar_lea.sflag [#allocation6], %s206_s26  ;;  %p1828_p7 = pneg %p2129_p5 }
  0x19   : > { %s215_s7 = scalar_lea.hbm %s2897_s1, %s1697_s29  ;;  %s1831_s23 = scalar_lea.hbm %s2897_s1, 1024 }
  0x1a   : > { %s216_s8 = sshll.u32 %s215_s7, 4  ;;  %s217_s8 = int_to_ptr.hbm [resolvable:$true] %s216_s8 }
  0x1b   : > { %s1824_s14 = sshra.s32 %s217_s8, 4  ;;  %s1825_s14 = int_to_ptr.hbm [resolvable:$true] %s1824_s14 }
  0x1c   : > { %s1826_s15 = scalar_lea.hbm %s1825_s14, 128  ;;  %p1832_p10 = scmp.lt.s32.totalorder %s1825_s14, %s2897_s1 }
  0x1d   : > { %p1827_p6 = scmp.ne.s32.totalorder %s1825_s14, %s1826_s15  ;;  %p1833_p11 = scmp.lt.s32.totalorder %s1831_s23, %s1826_s15 }
  0x1f   : > { %p1829_p8 = pnand %p1828_p7, %p1827_p6  ;;  %p1834_p12 = por %p1833_p11, %p1832_p10 }
  0x21   : > { %p1830_p9 = pneg %p1829_p8 }
  0x23   : > { %p1835_p13 = pnand %p1834_p12, %p1830_p9 }
  0x25   : > { %1838 = shalt.err (!%p1835_p13)
}
  0x26   : > { %s2050_s28 = smov 8192   ;;  %s2051_s29 = smov 1024  }
  0x27   : > { %s2052_s30 = smov 64   ;;  %s2154_s6 = sshll.u32 %s2048_s21, 4 }
  0x28   : > { %1735 = dma.hbm_to_vmem [thread:$0]  (!%p2129_p5), %s217_s8, 2048, %s219_s10, %s2137_s13, %s2050_s28, %s2051_s29, %s2052_s30  }
  0x29   : > { %s2899_s3 = sld [smem:[#allocation19_spill]]  ;;  %s251_s16 = scalar_lea.vmem [#allocation8], %s2133_s12 }
  0x2a   : > { %s259_s17 = sshll.u32 %s251_s16, 4  ;;  %s2163_s23 = scalar_lea.sflag [#allocation9], %s206_s26  ;;  %s260_s17 = int_to_ptr.vmem [resolvable:$true] %s259_s17 }
  0x2f   : > { %s255_s14 = scalar_lea.hbm %s2899_s3, %s2154_s6  ;;  %s1861_s28 = scalar_lea.hbm %s2899_s3, 128 }
  0x30   : > { %s257_s15 = sshll.u32 %s255_s14, 4  ;;  %s258_s15 = int_to_ptr.hbm [resolvable:$true] %s257_s15 }
  0x31   : > { %s1854_s24 = sshra.s32 %s258_s15, 4  ;;  %s1855_s24 = int_to_ptr.hbm [resolvable:$true] %s1854_s24 }
  0x32   : > { %s1856_s27 = scalar_lea.hbm %s1855_s24, 16  ;;  %p1862_p4 = scmp.lt.s32.totalorder %s1855_s24, %s2899_s3 }
  0x33   : > { %p1857_p1 = scmp.ne.s32.totalorder %s1855_s24, %s1856_s27  ;;  %p1863_p6 = scmp.lt.s32.totalorder %s1861_s28, %s1856_s27 }
  0x35   : > { %p1859_p2 = pnand %p1857_p1, %p1828_p7  ;;  %p1864_p8 = por %p1863_p6, %p1862_p4 }
  0x37   : > { %p1860_p3 = pneg %p1859_p2 }
  0x39   : > { %p1865_p9 = pnand %p1864_p8, %p1860_p3 }
  0x3b   : > { %1868 = shalt.err (!%p1865_p9)
}
  0x3c   : > { %1741 = dma.hbm_to_vmem [thread:$0]  (!%p2129_p5), %s258_s15, 256, %s260_s17, %s2163_s23  }
  0x3d   : > { %s2178_s26 = sadd.s32 4294967295, %s2048_s21   ;;  %s1593_s7 = sadd.s32 4294967294, %s2048_s21  }
  0x3e   : > { %p66_p10 = scmp.ne.s32.totalorder %s2040_s19, %s2036_s18  ;;  %p2890_p11 = scmp.eq.s32.totalorder %s2178_s26, 0 }
  0x3f   : > { %p168_p12 = scmp.eq.s32.totalorder %s2178_s26, 7  ;;  %p174_p13 = scmp.eq.s32.totalorder %s1593_s7, 7 }
  0x40   : > { %p2187_p1 = por %p2890_p11, %p66_p10  ;;  %p1594_p2 = scmp.ge.s32.totalorder %s2048_s21, 1 }
  0x41   : > { %p2195_p3 = por %p168_p12, %p60_p0  ;;  %p2199_p4 = por %p174_p13, %p66_p10 }
  0x42   : > { %p181_p6 = scmp.lt.s32.totalorder %s2048_s21, 9  ;;  %s2903_s0 = sld [smem:[#allocation17_spill]] }
  0x43   : > { %s2053_s8 = smov [#allocation2]   ;;  %s236_s30 = scalar_lea.hbm %s2886_s2, %s2154_s6 }
  0x44   : > { %p2207_p8 = pnand %p1594_p2, %p181_p6  ;;  %s195_s10 = sshll.u32 %s2053_s8, 4  ;;  %s196_s10 = int_to_ptr.vmem [resolvable:$true] %s195_s10 }
  0x45   : > { %s232_s7 = scalar_lea.vmem [#allocation7], %s2133_s12  ;;  %s238_s16 = sshll.u32 %s236_s30, 4  ;;  %s239_s16 = int_to_ptr.hbm [resolvable:$true] %s238_s16 }
  0x46   : > { %p1728_p0 = pneg %p2207_p8  ;;  %s240_s1 = sshll.u32 %s232_s7, 4  ;;  %s241_s1 = int_to_ptr.vmem [resolvable:$true] %s240_s1 }
  0x47   : > { %s1914_s17 = sshra.s32 %s239_s16, 4  ;;  %s1921_s28 = scalar_lea.hbm %s2886_s2, 128  ;;  %s1915_s17 = int_to_ptr.hbm [resolvable:$true] %s1914_s17 }
  0x48   : > { %s193_s24 = sshll.u32 %s2903_s0, 4  ;;  %p1729_p9 = pnand %p1728_p0, %p2890_p11  ;;  %s194_s24 = int_to_ptr.hbm [resolvable:$true] %s193_s24 }
  0x49   : > { %s1916_s0 = scalar_lea.hbm %s1915_s17, 16  ;;  %p1922_p2 = scmp.lt.s32.totalorder %s1915_s17, %s2886_s2 }
  0x4a   : > { %1731 = dma.hbm_to_vmem [thread:$0]  (!%p1729_p9), %s194_s24, 16, %s196_s10, [#allocation3]  }
  0x4b   : > { %p1917_p10 = scmp.ne.s32.totalorder %s1915_s17, %s1916_s0  ;;  %p1923_p6 = scmp.lt.s32.totalorder %s1921_s28, %s1916_s0 }
  0x4d   : > { %p1919_p12 = pnand %p1917_p10, %p1828_p7  ;;  %p1924_p0 = por %p1923_p6, %p1922_p2 }
  0x4f   : > { %p1920_p13 = pneg %p1919_p12 }
  0x51   : > { %p1925_p11 = pnand %p1924_p0, %p1920_p13 }
  0x53   : > { %1928 = shalt.err (!%p1925_p11)
}
  0x54   : > { %1738 = dma.hbm_to_vmem [thread:$0]  (!%p2129_p5), %s239_s16, 256, %s241_s1, %s2137_s13  }
  0x55   : > { %s274_s3 = scalar_lea.hbm %s2888_s4, %s2154_s6  ;;  %s270_s30 = scalar_lea.vmem [#allocation10], %s2133_s12 }
  0x56   : > { %s278_s8 = sshll.u32 %s270_s30, 4  ;;  %s276_s25 = sshll.u32 %s274_s3, 4  ;;  %s279_s8 = int_to_ptr.vmem [resolvable:$true] %s278_s8  ;;  %s277_s25 = int_to_ptr.hbm [resolvable:$true] %s276_s25 }
  0x57   : > { %s1944_s0 = sshra.s32 %s277_s25, 4  ;;  %s1951_s1 = scalar_lea.hbm %s2888_s4, 128  ;;  %s1945_s0 = int_to_ptr.hbm [resolvable:$true] %s1944_s0 }
  0x58   : > { %s1946_s17 = scalar_lea.hbm %s1945_s0, 16  ;;  %p1952_p12 = scmp.lt.s32.totalorder %s1945_s0, %s2888_s4 }
  0x59   : > { %p1947_p11 = scmp.ne.s32.totalorder %s1945_s0, %s1946_s17  ;;  %p1953_p13 = scmp.lt.s32.totalorder %s1951_s1, %s1946_s17 }
  0x5b   : > { %p1949_p9 = pnand %p1947_p11, %p1828_p7  ;;  %p1954_p2 = por %p1953_p13, %p1952_p12 }
  0x5d   : > { %p1950_p10 = pneg %p1949_p9 }
  0x5f   : > { %p1955_p6 = pnand %p1954_p2, %p1950_p10 }
  0x61   : > { %1958 = shalt.err (!%p1955_p6)
}
  0x62   : > { %1744 = dma.hbm_to_vmem [thread:$0]  (!%p2129_p5), %s277_s25, 256, %s279_s8, %s2163_s23  }
  0x63   : > { %287 = sbr.rel (%p2207_p8) target bundleno = 436 (0x1b4), region = 40  ;;  %p2905_p7 = scmp.eq.s32.totalorder (!%p2207_p8), %s2178_s26, 0 }
  0x68   : > { %2019 = dma.done.wait (%p2905_p7), [#allocation3], 16   ;;  %p2906_p0 = pmov %p2905_p7 }
  0x69   : > { %s294_s12 = sand.u32 1, %s2178_s26   ;;  %s2257_s6 = sand.u32 1, %s2040_s19  }
  0x6a   : > { %2021 = vsyncadd (%p2906_p0), [#allocation3], 4294967280  ;;  %s1608_s7 = sshll.u32 %s2257_s6, 7  ;;  %s295_s11 = scalar_lea.sflag [#allocation6], %s294_s12 }
  0x6b   : > { %s2260_s24 = scalar_lea.vmem [#allocation5], %s1608_s7 }
  0x6c   : > { %2023 = dma.done.wait (%p2187_p1), %s295_s11, 2304  }
  0x6d   : > { %2025 = vsyncadd (%p2187_p1), %s295_s11, 4294964992  ;;  %s2267_s25 = sshll.u32 %s2257_s6, 4  ;;  %s315_s27 = scalar_lea.sflag [#allocation9], %s294_s12 }
  0x6e   : > { %s308_s23 = scalar_lea.vmem [#allocation7], %s2267_s25  ;;  %s318_s10 = scalar_lea.vmem [#allocation8], %s2267_s25 }
  0x6f   : > { %2027 = dma.done.wait (%p2187_p1), %s315_s27, 512  }
  0x70   : > { %2029 = vsyncadd (%p2187_p1), %s315_s27, 4294966784  ;;  %vm510_vm0 = vcmask 130048   ;;  %v1615_v0 = vld [vmem:[%s2260_s24] sm:$0xf]  ;;  %v1698_v2 = vld [vmem:[%s2260_s24 + $0x4] sm:$0xf] }
  0x71   : > { %v1706_v1 = vld [vmem:[%s2260_s24 + $0x3c] sm:$0xf0]  ;;  %v1617_v4 = vld [vmem:[%s2260_s24 + $0x40] sm:$0xf0]  ;;  %v1623_v5 = vld [vmem:[%s2260_s24 + $0x8] sm:$0xf] }
  0x72   : > { %v1616_v3 = vor.u32 %v1706_v1, %v1615_v0  ;;  %v1707_v6 = vld [vmem:[%s2260_s24 + $0x44] sm:$0xf0]  ;;  %v1620_v7 = vor.u32 %v1698_v2, %v1617_v4  ;;  %v1699_v9 = vld [vmem:[%s2260_s24 + $0xc] sm:$0xf]  ;;  %v2283_v11 = vld [vmem:[#allocation2] sm:$0x1] }
  0x73   : > { %v1624_v8 = vor.u32 %v1707_v6, %v1623_v5  ;;  %v1625_v10 = vld [vmem:[%s2260_s24 + $0x48] sm:$0xf0]  ;;  %v1639_v13 = vld [vmem:[%s2260_s24 + $0x18] sm:$0xf]  ;;  %v1701_v15 = vld [vmem:[%s2260_s24 + $0x1c] sm:$0xf] }
  0x74   : > { %521 = vmatpush.bf16.msra.mxu0 %v1616_v3  ;;  %v1628_v12 = vor.u32 %v1699_v9, %v1625_v10  ;;  %v1709_v14 = vld [vmem:[%s2260_s24 + $0x54] sm:$0xf0]  ;;  %534 = vmatpush.bf16.msra.mxu1 %v1620_v7  ;;  %v1641_v17 = vld [vmem:[%s2260_s24 + $0x58] sm:$0xf0]  ;;  %v1631_v18 = vld [vmem:[%s2260_s24 + $0x10] sm:$0xf] }
  0x75   : > { %547 = vmatpush.bf16.msra.mxu2 %v1624_v8  ;;  %v1640_v16 = vor.u32 %v1709_v14, %v1639_v13  ;;  %v1708_v19 = vld [vmem:[%s2260_s24 + $0x4c] sm:$0xf0]  ;;  %v1644_v20 = vor.u32 %v1701_v15, %v1641_v17  ;;  %v1700_v22 = vld [vmem:[%s2260_s24 + $0x14] sm:$0xf]  ;;  %v1655_v24 = vld [vmem:[%s2260_s24 + $0x28] sm:$0xf] }
  0x76   : > { %560 = vmatpush.bf16.msra.mxu3 %v1628_v12  ;;  %v1632_v21 = vor.u32 %v1708_v19, %v1631_v18  ;;  %v1633_v23 = vld [vmem:[%s2260_s24 + $0x50] sm:$0xf0]  ;;  %v1711_v26 = vld [vmem:[%s2260_s24 + $0x64] sm:$0xf0]  ;;  %v1703_v27 = vld [vmem:[%s2260_s24 + $0x2c] sm:$0xf] }
  0x77   : > { %1677 = vmatmul.msk.bf16.vlgmr.msra.gmra.mxu0 %vm510_vm0, %v2283_v11  ;;  %v1636_v25 = vor.u32 %v1700_v22, %v1633_v23  ;;  %v1657_v28 = vld [vmem:[%s2260_s24 + $0x68] sm:$0xf0]  ;;  %1678 = vmatmul.msk.bf16.vlgmr.msra.gmra.mxu1 %vm510_vm0, %v2283_v11  ;;  %v1656_v29 = vor.u32 %v1711_v26, %v1655_v24  ;;  %v1647_v31 = vld [vmem:[%s2260_s24 + $0x20] sm:$0xf]  ;;  %v1702_v33 = vld [vmem:[%s2260_s24 + $0x24] sm:$0xf] }
  0x78   : > { %1679 = vmatmul.msk.bf16.vlgmr.msra.gmra.mxu2 %vm510_vm0, %v2283_v11  ;;  %v1660_v30 = vor.u32 %v1703_v27, %v1657_v28  ;;  %v1710_v32 = vld [vmem:[%s2260_s24 + $0x5c] sm:$0xf0]  ;;  %573 = vmatpush.bf16.msrb.mxu0 %v1632_v21  ;;  %v1649_v35 = vld [vmem:[%s2260_s24 + $0x60] sm:$0xf0]  ;;  %v1671_v37 = vld [vmem:[%s2260_s24 + $0x38] sm:$0xf] }
  0x79   : > { %599 = vmatpush.bf16.msrb.mxu2 %v1640_v16  ;;  %1680 = vmatmul.msk.bf16.vlgmr.msra.gmra.mxu3 %vm510_vm0, %v2283_v11  ;;  %v1648_v34 = vor.u32 %v1710_v32, %v1647_v31  ;;  %v1652_v36 = vor.u32 %v1702_v33, %v1649_v35  ;;  %v1713_v38 = vld [vmem:[%s2260_s24 + $0x74] sm:$0xf0]  ;;  %v1705_v39 = vld [vmem:[%s2260_s24 + $0x3c] sm:$0xf]  ;;  %v1663_v41 = vld [vmem:[%s2260_s24 + $0x30] sm:$0xf] }
  0x7a   : > { %612 = vmatpush.bf16.msrb.mxu3 %v1644_v20  ;;  %586 = vmatpush.bf16.msrb.mxu1 %v1636_v25  ;;  %v1673_v40 = vld [vmem:[%s2260_s24 + $0x78] sm:$0xf0]  ;;  %v1712_v42 = vld [vmem:[%s2260_s24 + $0x6c] sm:$0xf0]  ;;  %v1704_v43 = vld [vmem:[%s2260_s24 + $0x34] sm:$0xf]  ;;  %v1672_v45 = vor.u32 %v1713_v38, %v1671_v37 }
  0x7b   : > { %v1665_v44 = vld [vmem:[%s2260_s24 + $0x70] sm:$0xf0]  ;;  %v1676_v46 = vor.u32 %v1705_v39, %v1673_v40  ;;  %v1664_v47 = vor.u32 %v1712_v42, %v1663_v41  ;;  %v2054_v49 = vmov 2.0   ;;  %vm2891_vm1 = vcmask 1041408   ;;  %s328_s9 = scalar_lea.vmem [#allocation10], %s2267_s25  ;;  %s2814_s3 = scalar_lea.vmem [#allocation11], %s2267_s25 }
  0x7c   : > { %625 = vmatpush.bf16.msra.mxu0 %v1648_v34  ;;  %v1668_v48 = vor.u32 %v1704_v43, %v1665_v44  ;;  %1790 = vrcp.f32 %v2054_v49  ;;  %v2343_v51 = vld [vmem:[%s308_s23] sm:$0xff]  ;;  %vm1226_vm6 = vcmask 1040384   ;;  %vm2892_vm15 = vcmask 1042434   ;;  %s1694_s30 = sshll.u32 %s2178_s26, 4  ;;  %s1445_s26 = sshll.u32 %s2814_s3, 4  ;;  %s1446_s26 = int_to_ptr.vmem [resolvable:$true] %s1445_s26 }
  0x7d   : > { %651 = vmatpush.bf16.msra.mxu2 %v1656_v29  ;;  %v398_v52 = vperm.slane %v2343_v51, 0  ;;  %v399_v54 = vperm.slane %v2343_v51, 1  ;;  %v400_v63 = vperm.slane %v2343_v51, 2  ;;  %v401_v2 = vperm.slane %v2343_v51, 3  ;;  %s1443_s17 = scalar_lea.hbm %s2889_s5, %s1694_s30  ;;  %s1433_s29 = scalar_lea.sflag [#allocation4], %s2257_s6 }
  0x7e   : > { %664 = vmatpush.bf16.msra.mxu3 %v1660_v30  ;;  %638 = vmatpush.bf16.msra.mxu1 %v1652_v36  ;;  %v402_v24 = vperm.slane %v2343_v51, 4  ;;  %v403_v27 = vperm.slane %v2343_v51, 5  ;;  %s1447_s28 = sshll.u32 %s1443_s17, 4  ;;  %s1994_s7 = scalar_lea.hbm %s2889_s5, 128  ;;  %s1448_s28 = int_to_ptr.hbm [resolvable:$true] %s1447_s28 }
  0x7f   : > { %s1988_s1 = sshra.s32 %s1448_s28, 4  ;;  %s1989_s1 = int_to_ptr.hbm [resolvable:$true] %s1988_s1 }
  0x80   : > { %s1990_s13 = scalar_lea.hbm %s1989_s1, 16  ;;  %p1995_p11 = scmp.lt.s32.totalorder %s1989_s1, %s2889_s5 }
  0x81   : > { %p1991_p5 = scmp.ne.s32.totalorder %s1989_s1, %s1990_s13  ;;  %p1996_p9 = scmp.lt.s32.totalorder %s1994_s7, %s1990_s13 }
  0x82   : > { %v1791_v50 = vpop.eup %1790 }
  0x83   : > { %v836_v53 = vmul.f32 2.0, %v1791_v50  ;;  %vm840_vm2 = vweird.f32 %v1791_v50  ;;  %p1992_p1 = pnand %p1991_p5, %p2195_p3  ;;  %p1997_p10 = por %p1996_p9, %p1995_p11 }
  0x85   : > { %v837_v57 = vsub.f32 1.0, %v836_v53  ;;  %p1993_p8 = pneg %p1992_p1 }
  0x87   : > { %1681 = vmatmul.msk.bf16.vlgmr.msrb.gmra.mxu0 %vm510_vm0, %v2283_v11  ;;  %1682 = vmatmul.msk.bf16.vlgmr.msrb.gmra.mxu1 %vm510_vm0, %v2283_v11  ;;  %v838_v0 = vmul.f32 %v1791_v50, %v837_v57  ;;  %p1998_p12 = pnand %p1997_p10, %p1993_p8 }
  0x88   : > { %1683 = vmatmul.msk.bf16.vlgmr.msrb.gmra.mxu2 %vm510_vm0, %v2283_v11  ;;  %677 = vmatpush.bf16.msrb.mxu0 %v1664_v47 }
  0x89   : > { %1684 = vmatmul.msk.bf16.vlgmr.msrb.gmra.mxu3 %vm510_vm0, %v2283_v11  ;;  %703 = vmatpush.bf16.msrb.mxu2 %v1672_v45  ;;  %v839_v10 = vadd.f32 %v1791_v50, %v838_v0  ;;  %v404_v45 = vperm.slane %v2343_v51, 6 }
  0x8a   : > { %716 = vmatpush.bf16.msrb.mxu3 %v1676_v46  ;;  %690 = vmatpush.bf16.msrb.mxu1 %v1668_v48  ;;  %v2378_v46 = vld [vmem:[%s308_s23 + $0x8] sm:$0xff] }
  0x8b   : > { %v2359_v21 = vsel %vm840_vm2, %v1791_v50, %v839_v10 }
  0x97   : > { %1685 = vmatmul.msk.bf16.vlgmr.msra.gmra.mxu0 %vm510_vm0, %v2283_v11  ;;  %1686 = vmatmul.msk.bf16.vlgmr.msra.gmra.mxu1 %vm510_vm0, %v2283_v11 }
  0x98   : > { %1687 = vmatmul.msk.bf16.vlgmr.msra.gmra.mxu2 %vm510_vm0, %v2283_v11 }
  0x99   : > { %1688 = vmatmul.msk.bf16.vlgmr.msra.gmra.mxu3 %vm510_vm0, %v2283_v11 }
  0xa7   : > { %1689 = vmatmul.msk.bf16.vlgmr.msrb.gmra.mxu0 %vm510_vm0, %v2283_v11  ;;  %1690 = vmatmul.msk.bf16.vlgmr.msrb.gmra.mxu1 %vm510_vm0, %v2283_v11 }
  0xa8   : > { %1691 = vmatmul.msk.bf16.vlgmr.msrb.gmra.mxu2 %vm510_vm0, %v2283_v11 }
  0xa9   : > { %1692 = vmatmul.msk.bf16.vlgmr.msrb.gmra.mxu3 %vm510_vm0, %v2283_v11 }
  0xf4   : > { %v523_v55 = vpop.f32.mrf.mxu0  ;;  %v536_v58 = vpop.f32.mrf.mxu1 }
  0xf5   : > { %v524_v56 = vadd.f32 %v523_v55, %v398_v52  ;;  %v537_v59 = vadd.f32 %v536_v58, %v399_v54  ;;  %v405_v55 = vperm.slane %v2343_v51, 7 }
  0xf7   : > { %v723_v60 = vsel %vm2891_vm1, %v524_v56, 0.0  ;;  %v730_v62 = vsel %vm2891_vm1, %v537_v59, 0.0 }
  0xf8   : > { %v724_v61 = vrot.slane %v723_v60, 4  ;;  %v731_v1 = vrot.slane %v730_v62, 4 }
  0xfa   : > { %v725_v3 = vadd.f32 %v724_v61, %v723_v60  ;;  %v732_v4 = vadd.f32 %v731_v1, %v730_v62 }
  0xfb   : > { %v549_v5 = vpop.f32.mrf.mxu2 }
  0xfc   : > { %v726_v6 = vrot.slane %v725_v3, 2  ;;  %v2351_v7 = vadd.f32 %v549_v5, %v400_v63  ;;  %v562_v8 = vpop.f32.mrf.mxu3  ;;  %v525_v9 = vpop.f32.mrf.mxu0  ;;  %v733_v11 = vrot.slane %v732_v4, 2 }
  0xfd   : > { %v2353_v12 = vadd.f32 %v562_v8, %v401_v2  ;;  %v538_v13 = vpop.f32.mrf.mxu1 }
  0xfe   : > { %v727_v14 = vadd.f32 %v726_v6, %v725_v3  ;;  %v737_v15 = vsel %vm2891_vm1, %v2351_v7, 0.0  ;;  %v734_v16 = vadd.f32 %v733_v11, %v732_v4 }
  0xff   : > { %v738_v17 = vrot.slane %v737_v15, 4  ;;  %v744_v18 = vsel %vm2891_vm1, %v2353_v12, 0.0 }
 0x100   : > { %v728_v19 = vrot.slane %v727_v14, 1  ;;  %v745_v20 = vrot.slane %v744_v18, 4  ;;  %v735_v22 = vrot.slane %v734_v16, 1 }
 0x101   : > { %v739_v23 = vadd.f32 %v738_v17, %v737_v15 }
 0x102   : > { %v729_v25 = vadd.f32 %v728_v19, %v727_v14  ;;  %v746_v26 = vadd.f32 %v745_v20, %v744_v18  ;;  %v736_v28 = vadd.f32 %v735_v22, %v734_v16 }
 0x103   : > { %v740_v29 = vrot.slane %v739_v23, 2  ;;  %v551_v30 = vpop.f32.mrf.mxu2 }
 0x104   : > { %v842_v31 = vmul.f32 %v2359_v21, %v729_v25  ;;  %v747_v32 = vrot.slane %v746_v26, 2  ;;  %v564_v33 = vpop.f32.mrf.mxu3  ;;  %v575_v34 = vpop.f32.mrf.mxu0  ;;  %v843_v35 = vmul.f32 %v2359_v21, %v736_v28 }
 0x105   : > { %v741_v36 = vadd.f32 %v740_v29, %v739_v23  ;;  %v2365_v37 = vadd.f32 %v575_v34, %v402_v24  ;;  %v588_v38 = vpop.f32.mrf.mxu1 }
 0x106   : > { %v2367_v39 = vsub.f32 %v524_v56, %v842_v31  ;;  %v748_v40 = vadd.f32 %v747_v32, %v746_v26  ;;  %v2369_v41 = vadd.f32 %v588_v38, %v403_v27  ;;  %v2371_v42 = vsub.f32 %v537_v59, %v843_v35 }
 0x107   : > { %v742_v43 = vrot.slane %v741_v36, 1  ;;  %v751_v44 = vsel %vm2891_vm1, %v2365_v37, 0.0  ;;  %v406_v59 = vperm.slane %v2378_v46, 0 }
 0x108   : > { %v874_v47 = vmul.f32 %v2367_v39, %v2367_v39  ;;  %v749_v48 = vrot.slane %v748_v40, 1  ;;  %v752_v49 = vrot.slane %v751_v44, 4  ;;  %v758_v50 = vsel %vm2891_vm1, %v2369_v41, 0.0 }
 0x109   : > { %v875_v52 = vmul.f32 %v2371_v42, %v2371_v42  ;;  %v743_v53 = vadd.f32 %v742_v43, %v741_v36  ;;  %v759_v54 = vrot.slane %v758_v50, 4 }
 0x10a   : > { %v890_v56 = vsel %vm2891_vm1, %v874_v47, 0.0  ;;  %v750_v57 = vadd.f32 %v749_v48, %v748_v40  ;;  %v753_v58 = vadd.f32 %v752_v49, %v751_v44 }
 0x10b   : > { %v891_v60 = vrot.slane %v890_v56, 4  ;;  %v897_v61 = vsel %vm2891_vm1, %v875_v52, 0.0  ;;  %v844_v62 = vmul.f32 %v2359_v21, %v743_v53  ;;  %v760_v63 = vadd.f32 %v759_v54, %v758_v50  ;;  %v601_v0 = vpop.f32.mrf.mxu2 }
 0x10c   : > { %v898_v1 = vrot.slane %v897_v61, 4  ;;  %v845_v2 = vmul.f32 %v2359_v21, %v750_v57  ;;  %v754_v3 = vrot.slane %v753_v58, 2  ;;  %v2392_v4 = vadd.f32 %v601_v0, %v404_v45  ;;  %v614_v51 = vpop.f32.mrf.mxu3  ;;  %v577_v5 = vpop.f32.mrf.mxu0 }
 0x10d   : > { %v892_v6 = vadd.f32 %v891_v60, %v890_v56  ;;  %v2395_v8 = vsub.f32 %v2351_v7, %v844_v62  ;;  %v761_v9 = vrot.slane %v760_v63, 2  ;;  %v2397_v10 = vadd.f32 %v614_v51, %v405_v55  ;;  %v590_v11 = vpop.f32.mrf.mxu1 }
 0x10e   : > { %v899_v13 = vadd.f32 %v898_v1, %v897_v61  ;;  %v2400_v14 = vsub.f32 %v2353_v12, %v845_v2  ;;  %v755_v15 = vadd.f32 %v754_v3, %v753_v58  ;;  %v765_v16 = vsel %vm2891_vm1, %v2392_v4, 0.0 }
 0x10f   : > { %v893_v17 = vrot.slane %v892_v6, 2  ;;  %v876_v18 = vmul.f32 %v2395_v8, %v2395_v8  ;;  %v762_v19 = vadd.f32 %v761_v9, %v760_v63  ;;  %v766_v20 = vrot.slane %v765_v16, 4 }
 0x110   : > { %v900_v7 = vrot.slane %v899_v13, 2  ;;  %v877_v22 = vmul.f32 %v2400_v14, %v2400_v14  ;;  %v756_v23 = vrot.slane %v755_v15, 1  ;;  %v772_v24 = vsel %vm2891_vm1, %v2397_v10, 0.0 }
 0x111   : > { %v894_v12 = vadd.f32 %v893_v17, %v892_v6  ;;  %v904_v25 = vsel %vm2891_vm1, %v876_v18, 0.0  ;;  %v763_v26 = vrot.slane %v762_v19, 1  ;;  %v767_v27 = vadd.f32 %v766_v20, %v765_v16 }
 0x112   : > { %v901_v28 = vadd.f32 %v900_v7, %v899_v13  ;;  %v905_v29 = vrot.slane %v904_v25, 4  ;;  %v911_v30 = vsel %vm2891_vm1, %v877_v22, 0.0  ;;  %v757_v31 = vadd.f32 %v756_v23, %v755_v15 }
 0x113   : > { %v895_v32 = vrot.slane %v894_v12, 1  ;;  %v912_v33 = vrot.slane %v911_v30, 4  ;;  %v764_v34 = vadd.f32 %v763_v26, %v762_v19  ;;  %v768_v35 = vrot.slane %v767_v27, 2  ;;  %v603_v36 = vpop.f32.mrf.mxu2 }
 0x114   : > { %v902_v38 = vrot.slane %v901_v28, 1  ;;  %v906_v40 = vadd.f32 %v905_v29, %v904_v25  ;;  %v846_v43 = vmul.f32 %v2359_v21, %v757_v31  ;;  %v773_v44 = vrot.slane %v772_v24, 4  ;;  %v616_v45 = vpop.f32.mrf.mxu3  ;;  %v627_v47 = vpop.f32.mrf.mxu0 }
 0x115   : > { %v896_v48 = vadd.f32 %v895_v32, %v894_v12  ;;  %v913_v49 = vadd.f32 %v912_v33, %v911_v30  ;;  %v847_v50 = vmul.f32 %v2359_v21, %v764_v34  ;;  %v769_v52 = vadd.f32 %v768_v35, %v767_v27  ;;  %v2414_v53 = vpop.f32.mrf.mxu1 }
 0x116   : > { %v903_v54 = vadd.f32 %v902_v38, %v901_v28  ;;  %v907_v55 = vrot.slane %v906_v40, 2  ;;  %v2417_v56 = vsub.f32 %v2365_v37, %v846_v43  ;;  %v774_v57 = vadd.f32 %v773_v44, %v772_v24 }
 0x117   : > { %v1002_v58 = vmul.f32 %v896_v48, %v2359_v21  ;;  %v914_v60 = vrot.slane %v913_v49, 2  ;;  %v2421_v61 = vsub.f32 %v2369_v41, %v847_v50  ;;  %v770_v62 = vrot.slane %v769_v52, 1 }
 0x118   : > { %v1003_v63 = vmul.f32 %v903_v54, %v2359_v21  ;;  %v908_v0 = vadd.f32 %v907_v55, %v906_v40  ;;  %v878_v1 = vmul.f32 %v2417_v56, %v2417_v56  ;;  %v775_v2 = vrot.slane %v774_v57, 2 }
 0x119   : > { %v2426_v3 = vadd.f32 1e-05, %v1002_v58  ;;  %v915_v51 = vadd.f32 %v914_v60, %v913_v49  ;;  %v879_v37 = vmul.f32 %v2421_v61, %v2421_v61  ;;  %v771_v5 = vadd.f32 %v770_v62, %v769_v52 }
 0x11a   : > { %v2430_v6 = vadd.f32 1e-05, %v1003_v63  ;;  %v909_v9 = vrot.slane %v908_v0, 1  ;;  %v918_v41 = vsel %vm2891_vm1, %v878_v1, 0.0  ;;  %v776_v11 = vadd.f32 %v775_v2, %v774_v57 }
 0x11b   : > { %1792 = vrsqrt.f32 %v2426_v3  ;;  %v916_v13 = vrot.slane %v915_v51, 1  ;;  %v919_v15 = vrot.slane %v918_v41, 4  ;;  %v2434_v16 = vpop.f32.mrf.mxu2  ;;  %v925_v18 = vsel %vm2891_vm1, %v879_v37, 0.0 }
 0x11c   : > { %1794 = vrsqrt.f32 %v2430_v6  ;;  %v910_v17 = vadd.f32 %v909_v9, %v908_v0  ;;  %v2438_v19 = vpop.f32.mrf.mxu3  ;;  %v629_v20 = vpop.f32.mrf.mxu0  ;;  %v926_v23 = vrot.slane %v925_v18, 4  ;;  %v848_v24 = vmul.f32 %v2359_v21, %v771_v5 }
 0x11d   : > { %v917_v7 = vadd.f32 %v916_v13, %v915_v51  ;;  %v920_v22 = vadd.f32 %v919_v15, %v918_v41  ;;  %v642_v12 = vpop.f32.mrf.mxu1  ;;  %v777_v26 = vrot.slane %v776_v11, 1  ;;  %v2444_v27 = vadd.f32 %v627_v47, %v406_v59 }
 0x11e   : > { %v1004_v25 = vmul.f32 %v910_v17, %v2359_v21  ;;  %v927_v30 = vadd.f32 %v926_v23, %v925_v18  ;;  %v2448_v31 = vsub.f32 %v2392_v4, %v848_v24  ;;  %v407_v34 = vperm.slane %v2378_v46, 1 }
 0x11f   : > { %v1005_v28 = vmul.f32 %v917_v7, %v2359_v21  ;;  %v921_v29 = vrot.slane %v920_v22, 2  ;;  %v778_v33 = vadd.f32 %v777_v26, %v776_v11  ;;  %vm1052_vm3 = vweird.f32 %v2430_v6 }
 0x120   : > { %v2450_v32 = vadd.f32 1e-05, %v1004_v25  ;;  %v928_v40 = vrot.slane %v927_v30, 2  ;;  %v880_v59 = vmul.f32 %v2448_v31, %v2448_v31  ;;  %v779_v45 = vsel %vm2891_vm1, %v2444_v27, 0.0 }
 0x121   : > { %v2453_v35 = vpop.eup %1792  ;;  %v2455_v36 = vadd.f32 1e-05, %v1005_v28  ;;  %v922_v38 = vadd.f32 %v921_v29, %v920_v22  ;;  %vm1042_vm4 = vweird.f32 %v2426_v3  ;;  %v849_v58 = vmul.f32 %v2359_v21, %v778_v33 }
 0x122   : > { %v1795_v43 = vpop.eup %1794  ;;  %v1037_v44 = vmul.f32 %v2453_v35, %v2426_v3  ;;  %1796 = vrsqrt.f32 %v2450_v32  ;;  %v929_v50 = vadd.f32 %v928_v40, %v927_v30  ;;  %v932_v52 = vsel %vm2891_vm1, %v880_v59, 0.0 }
 0x123   : > { %v1047_v4 = vmul.f32 %v1795_v43, %v2430_v6  ;;  %1798 = vrsqrt.f32 %v2455_v36  ;;  %v655_v47 = vpop.f32.mrf.mxu2  ;;  %v923_v49 = vrot.slane %v922_v38, 1  ;;  %v933_v57 = vrot.slane %v932_v52, 4 }
 0x124   : > { %v1038_v48 = vmul.f32 %v2453_v35, %v1037_v44  ;;  %v668_v54 = vpop.f32.mrf.mxu3  ;;  %v2472_v60 = vadd.f32 %v2414_v53, %v407_v34  ;;  %v930_v0 = vrot.slane %v929_v50, 1  ;;  %v780_v1 = vrot.slane %v779_v45, 4  ;;  %v2480_v18 = vpop.f32.mrf.mxu0 }
 0x125   : > { %v1048_v55 = vmul.f32 %v1795_v43, %v1047_v4  ;;  %v924_v63 = vadd.f32 %v923_v49, %v922_v38  ;;  %vm1043_vm5 = vweird.f32 %v2453_v35  ;;  %v934_v51 = vadd.f32 %v933_v57, %v932_v52  ;;  %v2482_v20 = vpop.f32.mrf.mxu1 }
 0x126   : > { %v1039_v62 = vmul.f32 0.5, %v1038_v48  ;;  %vm1053_vm7 = vweird.f32 %v1795_v43  ;;  %v931_v41 = vadd.f32 %v930_v0, %v929_v50  ;;  %v2478_v17 = vsub.f32 %v2397_v10, %v849_v58  ;;  %vm1044_vm10 = vmor %vm1042_vm4, %vm1043_vm5 }
 0x127   : > { %v1049_v2 = vmul.f32 0.5, %v1048_v55  ;;  %v1006_v9 = vmul.f32 %v924_v63, %v2359_v21  ;;  %v935_v15 = vrot.slane %v934_v51, 2  ;;  %v781_v24 = vadd.f32 %v780_v1, %v779_v45  ;;  %vm1054_vm8 = vmor %vm1052_vm3, %vm1053_vm7 }
 0x128   : > { %v1797_v37 = vpop.eup %1796  ;;  %v1040_v5 = vsub.f32 1.5, %v1039_v62  ;;  %v1007_v26 = vmul.f32 %v931_v41, %v2359_v21  ;;  %v786_v29 = vsel %vm2891_vm1, %v2472_v60, 0.0  ;;  %v881_v59 = vmul.f32 %v2478_v17, %v2478_v17 }
 0x129   : > { %v1799_v11 = vpop.eup %1798  ;;  %v1050_v13 = vsub.f32 1.5, %v1049_v2  ;;  %v1057_v53 = vmul.f32 %v1797_v37, %v2450_v32  ;;  %v2486_v23 = vadd.f32 1e-05, %v1006_v9  ;;  %v936_v28 = vadd.f32 %v935_v15, %v934_v51 }
 0x12a   : > { %v1041_v7 = vmul.f32 %v2453_v35, %v1040_v5  ;;  %v1067_v22 = vmul.f32 %v1799_v11, %v2455_v36  ;;  %vm1063_vm9 = vweird.f32 %v1797_v37  ;;  %v2495_v34 = vadd.f32 1e-05, %v1007_v26 }
 0x12b   : > { %v1051_v12 = vmul.f32 %v1795_v43, %v1050_v13  ;;  %v1058_v25 = vmul.f32 %v1797_v37, %v1057_v53  ;;  %1800 = vrsqrt.f32 %v2486_v23  ;;  %v937_v38 = vrot.slane %v936_v28, 1  ;;  %v2509_v54 = vpop.f32.mrf.mxu2 }
 0x12c   : > { %v1068_v10 = vmul.f32 %v1799_v11, %v1067_v22  ;;  %v782_v44 = vrot.slane %v781_v24, 2  ;;  %v1045_v4 = vsel %vm1044_vm10, %v2453_v35, %v1041_v7  ;;  %1802 = vrsqrt.f32 %v2495_v34  ;;  %v681_v55 = vpop.f32.mrf.mxu0  ;;  %v2528_v7 = vpop.f32.mrf.mxu3 }
 0x12d   : > { %v1055_v30 = vsel %vm1054_vm8, %v1795_v43, %v1051_v12  ;;  %v1059_v33 = vmul.f32 0.5, %v1058_v25  ;;  %v938_v43 = vadd.f32 %v937_v38, %v936_v28  ;;  %vm1073_vm11 = vweird.f32 %v1799_v11  ;;  %v694_v62 = vpop.f32.mrf.mxu1 }
 0x12e   : > { %v1212_v40 = vrot.slane %v1055_v30, 7  ;;  %v1069_v6 = vmul.f32 0.5, %v1068_v10  ;;  %v939_v48 = vsel %vm2891_vm1, %v881_v59, 0.0  ;;  %vm1062_vm12 = vweird.f32 %v2450_v32 }
 0x12f   : > { %v1060_v45 = vsub.f32 1.5, %v1059_v33  ;;  %v1008_v50 = vmul.f32 %v938_v43, %v2359_v21  ;;  %v940_v52 = vrot.slane %v939_v48, 4  ;;  %vm1064_vm13 = vmor %vm1062_vm12, %vm1063_vm9  ;;  %vm1072_vm14 = vweird.f32 %v2455_v36 }
 0x130   : > { %v1070_v47 = vsub.f32 1.5, %v1069_v6  ;;  %v1227_v49 = vsel %vm1226_vm6, %v1045_v4, %v1212_v40  ;;  %v783_v58 = vadd.f32 %v782_v44, %v781_v24  ;;  %vm1074_vm0 = vmor %vm1072_vm14, %vm1073_vm11  ;;  %v787_v1 = vrot.slane %v786_v29, 4 }
 0x131   : > { %v1061_v3 = vmul.f32 %v1797_v37, %v1060_v45  ;;  %v2511_v35 = vpop.eup %1800  ;;  %v2518_v0 = vadd.f32 1e-05, %v1008_v50  ;;  %v941_v5 = vadd.f32 %v940_v52, %v939_v48  ;;  %v408_v9 = vperm.slane %v2378_v46, 2 }
 0x132   : > { %v1071_v57 = vmul.f32 %v1799_v11, %v1070_v47  ;;  %v1077_v32 = vmul.f32 %v2511_v35, %v2486_v23  ;;  %v2521_v41 = vpop.eup %1802  ;;  %vm1082_vm2 = vweird.f32 %v2486_v23  ;;  %v784_v24 = vrot.slane %v783_v58, 1 }
 0x133   : > { %v1065_v63 = vsel %vm1064_vm13, %v1797_v37, %v1061_v3  ;;  %1804 = vrsqrt.f32 %v2518_v0  ;;  %v409_v37 = vperm.slane %v2378_v46, 3  ;;  %v1087_v53 = vmul.f32 %v2521_v41, %v2495_v34  ;;  %v707_v40 = vpop.f32.mrf.mxu2 }
 0x134   : > { %v1213_v2 = vrot.slane %v1065_v63, 6  ;;  %v1075_v51 = vsel %vm1074_vm0, %v1799_v11, %v1071_v57  ;;  %v1078_v13 = vmul.f32 %v2511_v35, %v1077_v32  ;;  %v942_v15 = vrot.slane %v941_v5, 2 }
 0x135   : > { %v1214_v36 = vrot.slane %v1075_v51, 5  ;;  %v1088_v12 = vmul.f32 %v2521_v41, %v1087_v53  ;;  %v788_v28 = vadd.f32 %v787_v1, %v786_v29  ;;  %v785_v30 = vadd.f32 %v784_v24, %v783_v58  ;;  %v720_v58 = vpop.f32.mrf.mxu3 }
 0x136   : > { %v1079_v22 = vmul.f32 0.5, %v1078_v13  ;;  %v943_v25 = vadd.f32 %v942_v15, %v941_v5  ;;  %v2537_v33 = vadd.f32 %v2434_v16, %v408_v9  ;;  %v2540_v38 = vadd.f32 %v2438_v19, %v409_v37 }
 0x137   : > { %v1229_v11 = vsel %vm2892_vm15, %v1213_v2, %v1214_v36  ;;  %vm1083_vm3 = vweird.f32 %v2511_v35  ;;  %v1089_v6 = vmul.f32 0.5, %v1088_v12  ;;  %v789_v44 = vrot.slane %v788_v28, 2 }
 0x138   : > { %v2534_v26 = vsel %vm2891_vm1, %v1227_v49, %v1229_v11  ;;  %v1080_v10 = vsub.f32 1.5, %v1079_v22  ;;  %v944_v59 = vrot.slane %v943_v25, 1  ;;  %v850_v29 = vmul.f32 %v2359_v21, %v785_v30  ;;  %vm2556_vm4 = vmor %vm1082_vm2, %vm1083_vm3 }
 0x139   : > { %v2543_v4 = vpop.eup %1804  ;;  %v793_v43 = vsel %vm2891_vm1, %v2537_v33, 0.0  ;;  %v410_v16 = vperm.slane %v2378_v46, 4  ;;  %v1090_v47 = vsub.f32 1.5, %v1089_v6  ;;  %v800_v49 = vsel %vm2891_vm1, %v2540_v38, 0.0 }
 0x13a   : > { %v1081_v45 = vmul.f32 %v2511_v35, %v1080_v10  ;;  %v1097_v19 = vmul.f32 %v2543_v4, %v2518_v0  ;;  %v945_v48 = vadd.f32 %v944_v59, %v943_v25  ;;  %vm1092_vm5 = vweird.f32 %v2495_v34 }
 0x13b   : > { %vm1093_vm7 = vweird.f32 %v2521_v41  ;;  %v2563_v50 = vsub.f32 %v2444_v27, %v850_v29  ;;  %v1091_v55 = vmul.f32 %v2521_v41, %v1090_v47  ;;  %v790_v63 = vadd.f32 %v789_v44, %v788_v28 }
 0x13c   : > { %v1085_v52 = vsel %vm2556_vm4, %v2511_v35, %v1081_v45  ;;  %v1098_v57 = vmul.f32 %v2543_v4, %v1097_v19  ;;  %v1009_v23 = vmul.f32 %v945_v48, %v2359_v21  ;;  %v794_v32 = vrot.slane %v793_v43, 4  ;;  %vm2587_vm10 = vmor %vm1092_vm5, %vm1093_vm7 }
 0x13d   : > { %v882_v62 = vmul.f32 %v2563_v50, %v2563_v50  ;;  %v801_v1 = vrot.slane %v800_v49, 4  ;;  %vm1102_vm8 = vweird.f32 %v2518_v0  ;;  %v2577_v35 = vadd.f32 %v2480_v18, %v410_v16 }
 0x13e   : > { %v1099_v2 = vmul.f32 0.5, %v1098_v57  ;;  %v2574_v27 = vadd.f32 1e-05, %v1009_v23  ;;  %vm1103_vm9 = vweird.f32 %v2543_v4  ;;  %v791_v5 = vrot.slane %v790_v63, 1 }
 0x13f   : > { %v946_v51 = vsel %vm2891_vm1, %v882_v62, 0.0  ;;  %v795_v9 = vadd.f32 %v794_v32, %v793_v43  ;;  %v2581_v36 = vrot.slane %v1085_v52, 4  ;;  %v1095_v53 = vsel %vm2587_vm10, %v2521_v41, %v1091_v55  ;;  %vm2608_vm11 = vmor %vm1102_vm8, %vm1103_vm9 }
 0x140   : > { %v1100_v37 = vsub.f32 1.5, %v1099_v2  ;;  %1806 = vrsqrt.f32 %v2574_v27  ;;  %v947_v18 = vrot.slane %v946_v51, 4  ;;  %v792_v15 = vadd.f32 %v791_v5, %v790_v63 }
 0x141   : > { %v796_v22 = vrot.slane %v795_v9, 2  ;;  %v802_v11 = vadd.f32 %v801_v1, %v800_v49  ;;  %v807_v34 = vsel %vm2891_vm1, %v2577_v35, 0.0  ;;  %v411_v25 = vperm.slane %v2378_v46, 5 }
 0x142   : > { %v2596_v24 = vmul.f32 %v2543_v4, %v1100_v37  ;;  %v948_v12 = vadd.f32 %v947_v18, %v946_v51  ;;  %v851_v28 = vmul.f32 %v2359_v21, %v792_v15  ;;  %v808_v40 = vrot.slane %v807_v34, 4 }
 0x143   : > { %v797_v10 = vadd.f32 %v796_v22, %v795_v9  ;;  %v803_v30 = vrot.slane %v802_v11, 2  ;;  %v2602_v6 = vrot.slane %v1095_v53, 3  ;;  %v2613_v44 = vadd.f32 %v2482_v20, %v411_v25 }
 0x144   : > { %v949_v59 = vrot.slane %v948_v12, 2  ;;  %v412_v45 = vperm.slane %v2378_v46, 6  ;;  %v1105_v29 = vsel %vm2608_vm11, %v2543_v4, %v2596_v24  ;;  %v2621_v43 = vsub.f32 %v2472_v60, %v851_v28 }
 0x145   : > { %v798_v16 = vrot.slane %v797_v10, 1  ;;  %v804_v0 = vadd.f32 %v803_v30, %v802_v11  ;;  %v809_v48 = vadd.f32 %v808_v40, %v807_v34  ;;  %v814_v49 = vsel %vm2891_vm1, %v2613_v44, 0.0 }
 0x146   : > { %v1807_v47 = vpop.eup %1806  ;;  %v950_v19 = vadd.f32 %v949_v59, %v948_v12  ;;  %v2626_v20 = vadd.f32 %v2509_v54, %v412_v45  ;;  %vm1112_vm12 = vweird.f32 %v2574_v27  ;;  %vm1231_vm14 = vcmask 1044484  }
 0x147   : > { %v1107_v3 = vmul.f32 %v1807_v47, %v2574_v27  ;;  %vm1113_vm13 = vweird.f32 %v1807_v47  ;;  %v883_v60 = vmul.f32 %v2621_v43, %v2621_v43  ;;  %v799_v4 = vadd.f32 %v798_v16, %v797_v10 }
 0x148   : > { %v951_v52 = vrot.slane %v950_v19, 1  ;;  %v805_v55 = vrot.slane %v804_v0, 1  ;;  %v810_v57 = vrot.slane %v809_v48, 2  ;;  %v815_v23 = vrot.slane %v814_v49, 4  ;;  %vm1114_vm4 = vmor %vm1112_vm12, %vm1113_vm13 }
 0x149   : > { %v1108_v58 = vmul.f32 %v1807_v47, %v1107_v3  ;;  %vm1233_vm0 = vcmask 1046534   ;;  %v953_v62 = vsel %vm2891_vm1, %v883_v60, 0.0  ;;  %v852_v54 = vmul.f32 %v2359_v21, %v799_v4 }
 0x14a   : > { %v821_v63 = vsel %vm2891_vm1, %v2626_v20, 0.0  ;;  %vm1235_vm2 = vcmask 1045508   ;;  %v952_v32 = vadd.f32 %v951_v52, %v950_v19  ;;  %v954_v1 = vrot.slane %v953_v62, 4 }
 0x14b   : > { %v806_v2 = vadd.f32 %v805_v55, %v804_v0  ;;  %v811_v51 = vadd.f32 %v810_v57, %v809_v48  ;;  %v1109_v5 = vmul.f32 0.5, %v1108_v58  ;;  %v2637_v9 = vsub.f32 %v2537_v33, %v852_v54 }
 0x14c   : > { %v816_v13 = vadd.f32 %v815_v23, %v814_v49  ;;  %v822_v37 = vrot.slane %v821_v63, 4  ;;  %vm1237_vm3 = vcmask 1043456   ;;  %v1010_v18 = vmul.f32 %v952_v32, %v2359_v21 }
 0x14d   : > { %v955_v53 = vadd.f32 %v954_v1, %v953_v62  ;;  %v853_v15 = vmul.f32 %v2359_v21, %v806_v2  ;;  %v812_v22 = vrot.slane %v811_v51, 1  ;;  %v1110_v11 = vsub.f32 1.5, %v1109_v5 }
 0x14e   : > { %v884_v24 = vmul.f32 %v2637_v9, %v2637_v9  ;;  %v817_v12 = vrot.slane %v816_v13, 2  ;;  %v823_v34 = vadd.f32 %v822_v37, %v821_v63  ;;  %v2643_v25 = vadd.f32 1e-05, %v1010_v18  ;;  %v1018_v37 = vld [vmem:[%s318_s10] sm:$0xff] }
 0x14f   : > { %v956_v28 = vrot.slane %v955_v53, 2  ;;  %v2646_v33 = vsub.f32 %v2540_v38, %v853_v15  ;;  %v813_v10 = vadd.f32 %v812_v22, %v811_v51  ;;  %v1111_v30 = vmul.f32 %v1807_v47, %v1110_v11 }
 0x150   : > { %v960_v40 = vsel %vm2891_vm1, %v884_v24, 0.0  ;;  %v818_v41 = vadd.f32 %v817_v12, %v816_v13  ;;  %v824_v59 = vrot.slane %v823_v34, 2  ;;  %v1217_v45 = vrot.slane %v1105_v29, 2 }
 0x151   : > { %1808 = vrsqrt.f32 %v2643_v25  ;;  %v957_v16 = vadd.f32 %v956_v28, %v955_v53  ;;  %v961_v0 = vrot.slane %v960_v40, 4  ;;  %v1115_v19 = vsel %vm1114_vm4, %v1807_v47, %v1111_v30 }
 0x152   : > { %v885_v38 = vmul.f32 %v2646_v33, %v2646_v33  ;;  %v854_v48 = vmul.f32 %v2359_v21, %v813_v10  ;;  %v819_v49 = vrot.slane %v818_v41, 1  ;;  %v1218_v3 = vrot.slane %v1115_v19, 1 }
 0x153   : > { %v1232_v29 = vsel %vm1231_vm14, %v2581_v36, %v2602_v6  ;;  %v958_v60 = vrot.slane %v957_v16, 1  ;;  %v962_v4 = vadd.f32 %v961_v0, %v960_v40  ;;  %v825_v47 = vadd.f32 %v824_v59, %v823_v34 }
 0x154   : > { %v967_v27 = vsel %vm2891_vm1, %v885_v38, 0.0  ;;  %v2661_v52 = vsub.f32 %v2577_v35, %v854_v48  ;;  %v820_v55 = vadd.f32 %v819_v49, %v818_v41  ;;  %v1234_v57 = vsel %vm1233_vm0, %v1217_v45, %v1218_v3 }
 0x155   : > { %v959_v23 = vadd.f32 %v958_v60, %v957_v16  ;;  %v963_v58 = vrot.slane %v962_v4, 2  ;;  %v968_v62 = vrot.slane %v967_v27, 4  ;;  %v1236_v54 = vsel %vm1235_vm2, %v1232_v29, %v1234_v57 }
 0x156   : > { %v886_v36 = vmul.f32 %v2661_v52, %v2661_v52  ;;  %v855_v6 = vmul.f32 %v2359_v21, %v820_v55  ;;  %v1238_v2 = vsel %vm1237_vm3, %v2534_v26, %v1236_v54  ;;  %v826_v13 = vrot.slane %v825_v47, 1 }
 0x157   : > { %v2668_v63 = vpop.eup %1808  ;;  %v1011_v35 = vmul.f32 %v959_v23, %v2359_v21  ;;  %v964_v32 = vadd.f32 %v963_v58, %v962_v4  ;;  %v969_v1 = vadd.f32 %v968_v62, %v967_v27  ;;  %v2685_v34 = vmul.f32 %v1238_v2, %v1018_v37 }
 0x158   : > { %v1117_v51 = vmul.f32 %v2668_v63, %v2643_v25  ;;  %v974_v5 = vsel %vm2891_vm1, %v886_v36, 0.0  ;;  %v2682_v24 = vsub.f32 %v2613_v44, %v855_v6  ;;  %v827_v41 = vadd.f32 %v826_v13, %v825_v47  ;;  %v2693_v44 = vld [vmem:[%s328_s9] sm:$0xff] }
 0x159   : > { %v2678_v18 = vadd.f32 1e-05, %v1011_v35  ;;  %v965_v53 = vrot.slane %v964_v32, 1  ;;  %v970_v15 = vrot.slane %v969_v1, 2  ;;  %v975_v22 = vrot.slane %v974_v5, 4 }
 0x15a   : > { %v1118_v11 = vmul.f32 %v2668_v63, %v1117_v51  ;;  %v887_v40 = vmul.f32 %v2682_v24, %v2682_v24  ;;  %v856_v38 = vmul.f32 %v2359_v21, %v827_v41  ;;  %v413_v49 = vperm.slane %v2378_v46, 7 }
 0x15b   : > { %1810 = vrsqrt.f32 %v2678_v18  ;;  %v966_v26 = vadd.f32 %v965_v53, %v964_v32  ;;  %v971_v12 = vadd.f32 %v970_v15, %v969_v1  ;;  %v976_v28 = vadd.f32 %v975_v22, %v974_v5 }
 0x15c   : > { %v1119_v59 = vmul.f32 0.5, %v1118_v11  ;;  %v981_v19 = vsel %vm2891_vm1, %v887_v40, 0.0  ;;  %v1258_v29 = vperm.slane %v2685_v34, 6  ;;  %v1310_v27 = vperm.slane %v2693_v44, 6 }
 0x15d   : > { %v1012_v10 = vmul.f32 %v966_v26, %v2359_v21  ;;  %v972_v30 = vrot.slane %v971_v12, 1  ;;  %v977_v45 = vrot.slane %v976_v28, 2  ;;  %v982_v4 = vrot.slane %v981_v19, 4 }
 0x15e   : > { %v1311_v55 = vperm.slane %v2693_v44, 7  ;;  %v1120_v47 = vsub.f32 1.5, %v1119_v59  ;;  %v2709_v46 = vsub.f32 %v2626_v20, %v856_v38  ;;  %vm1122_vm5 = vweird.f32 %v2643_v25 }
 0x15f   : > { %v2695_v16 = vadd.f32 1e-05, %v1012_v10  ;;  %v973_v0 = vadd.f32 %v972_v30, %v971_v12  ;;  %v978_v48 = vadd.f32 %v977_v45, %v976_v28  ;;  %v983_v62 = vadd.f32 %v982_v4, %v981_v19 }
 0x160   : > { %vm1123_vm7 = vweird.f32 %v2668_v63  ;;  %v2714_v36 = vadd.f32 %v2528_v7, %v413_v49  ;;  %v1259_v6 = vperm.slane %v2685_v34, 7  ;;  %v1290_v35 = vmul.f32 %v1258_v29, %v2448_v31 }
 0x161   : > { %v1811_v3 = vpop.eup %1810  ;;  %1812 = vrsqrt.f32 %v2695_v16  ;;  %v1013_v60 = vmul.f32 %v973_v0, %v2359_v21  ;;  %v979_v58 = vrot.slane %v978_v48, 1  ;;  %v984_v32 = vrot.slane %v983_v62, 2  ;;  %vm2734_vm10 = vmor %vm1122_vm5, %vm1123_vm7 }
 0x162   : > { %v1127_v57 = vmul.f32 %v1811_v3, %v2678_v18  ;;  %vm1132_vm8 = vweird.f32 %v2678_v18  ;;  %v888_v20 = vmul.f32 %v2709_v46, %v2709_v46  ;;  %v828_v2 = vsel %vm2891_vm1, %v2714_v36, 0.0 }
 0x163   : > { %v2706_v23 = vadd.f32 1e-05, %v1013_v60  ;;  %v1121_v7 = vmul.f32 %v2668_v63, %v1120_v47  ;;  %v980_v5 = vadd.f32 %v979_v58, %v978_v48  ;;  %v985_v13 = vadd.f32 %v984_v32, %v983_v62 }
 0x164   : > { %v1128_v54 = vmul.f32 %v1811_v3, %v1127_v57  ;;  %v829_v37 = vrot.slane %v828_v2, 4  ;;  %vm1133_vm9 = vweird.f32 %v1811_v3  ;;  %v988_v15 = vsel %vm2891_vm1, %v888_v20, 0.0 }
 0x165   : > { %1814 = vrsqrt.f32 %v2706_v23  ;;  %v1291_v22 = vmul.f32 %v1259_v6, %v2478_v17  ;;  %v2728_v11 = vadd.f32 %v1310_v27, %v1290_v35  ;;  %v989_v26 = vrot.slane %v988_v15, 4  ;;  %vm1134_vm12 = vmor %vm1132_vm8, %vm1133_vm9 }
 0x166   : > { %v1129_v1 = vmul.f32 0.5, %v1128_v54  ;;  %v830_v12 = vadd.f32 %v829_v37, %v828_v2  ;;  %vm1142_vm11 = vweird.f32 %v2695_v16  ;;  %v986_v40 = vrot.slane %v985_v13, 1 }
 0x167   : > { %v1813_v51 = vpop.eup %1812  ;;  %v1125_v17 = vsel %vm2734_vm10, %v2668_v63, %v1121_v7  ;;  %v1014_v59 = vmul.f32 %v980_v5, %v2359_v21  ;;  %v990_v25 = vadd.f32 %v989_v26, %v988_v15  ;;  %v1252_v45 = vperm.slane %v2685_v34, 0 }
 0x168   : > { %v1130_v53 = vsub.f32 1.5, %v1129_v1  ;;  %v1137_v31 = vmul.f32 %v1813_v51, %v2695_v16  ;;  %v1253_v48 = vperm.slane %v2685_v34, 1  ;;  %vm1143_vm13 = vweird.f32 %v1813_v51 }
 0x169   : > { %v991_v29 = vrot.slane %v990_v25, 2  ;;  %v831_v60 = vrot.slane %v830_v12, 2  ;;  %v987_v27 = vadd.f32 %v986_v40, %v985_v13  ;;  %v1254_v18 = vperm.slane %v2685_v34, 2  ;;  %vm1144_vm4 = vmor %vm1142_vm11, %vm1143_vm13 }
 0x16a   : > { %v1131_v10 = vmul.f32 %v1811_v3, %v1130_v53  ;;  %v1138_v30 = vmul.f32 %v1813_v51, %v1137_v31  ;;  %v1284_v6 = vmul.f32 %v1252_v45, %v2367_v39  ;;  %v1285_v35 = vmul.f32 %v1253_v48, %v2371_v42 }
 0x16b   : > { %v1815_v41 = vpop.eup %1814  ;;  %v992_v57 = vadd.f32 %v991_v29, %v990_v25  ;;  %v832_v58 = vadd.f32 %v831_v60, %v830_v12  ;;  %v1343_v32 = vadd.f32 %v1311_v55, %v1291_v22  ;;  %v1358_v1 = vmax.f32 %v2728_v11, 0.0 }
 0x16c   : > { %v1135_v0 = vsel %vm1134_vm12, %v1811_v3, %v1131_v10  ;;  %v1139_v19 = vmul.f32 0.5, %v1138_v30  ;;  %v1147_v38 = vmul.f32 %v1815_v41, %v2706_v23  ;;  %v1255_v3 = vperm.slane %v2685_v34, 3 }
 0x16d   : > { %v1219_v49 = vrot.slane %v1135_v0, 7  ;;  %v993_v20 = vrot.slane %v992_v57, 1  ;;  %v833_v2 = vrot.slane %v832_v58, 1  ;;  %vm1153_vm5 = vweird.f32 %v1815_v41 }
 0x16e   : > { %v1140_v4 = vsub.f32 1.5, %v1139_v19  ;;  %v1148_v63 = vmul.f32 %v1815_v41, %v1147_v38  ;;  %v1015_v13 = vmul.f32 %v987_v27, %v2359_v21  ;;  %vm1152_vm7 = vweird.f32 %v2706_v23 }
 0x16f   : > { %v1239_v47 = vsel %vm1226_vm6, %v1125_v17, %v1219_v49  ;;  %v994_v39 = vadd.f32 %v993_v20, %v992_v57  ;;  %v834_v42 = vadd.f32 %v833_v2, %v832_v58  ;;  %v1286_v37 = vmul.f32 %v1254_v18, %v2395_v8  ;;  %vm1154_vm8 = vmor %vm1152_vm7, %vm1153_vm5 }
 0x170   : > { %v1141_v62 = vmul.f32 %v1813_v51, %v1140_v4  ;;  %v1149_v54 = vmul.f32 0.5, %v1148_v63  ;;  %v2762_v53 = vadd.f32 1e-05, %v1014_v59  ;;  %v1256_v31 = vperm.slane %v2685_v34, 4 }
 0x171   : > { %v1287_v16 = vmul.f32 %v1255_v3, %v2400_v14  ;;  %v857_v22 = vmul.f32 %v2359_v21, %v834_v42  ;;  %v1257_v11 = vperm.slane %v2685_v34, 5  ;;  %v1359_v23 = vmax.f32 %v1343_v32, 0.0 }
 0x172   : > { %v1145_v7 = vsel %vm1144_vm4, %v1813_v51, %v1141_v62  ;;  %v1150_v5 = vsub.f32 1.5, %v1149_v54  ;;  %v1016_v51 = vmul.f32 %v994_v39, %v2359_v21  ;;  %v2769_v12 = vadd.f32 1e-05, %v1015_v13 }
 0x173   : > { %v1220_v15 = vrot.slane %v1145_v7, 6  ;;  %v1304_v8 = vperm.slane %v2693_v44, 0  ;;  %v2773_v10 = vsub.f32 %v2714_v36, %v857_v22  ;;  %v1305_v14 = vperm.slane %v2693_v44, 1 }
 0x174   : > { %v1151_v55 = vmul.f32 %v1815_v41, %v1150_v5  ;;  %v1306_v30 = vperm.slane %v2693_v44, 2  ;;  %1816 = vrsqrt.f32 %v2762_v53  ;;  %v2778_v40 = vadd.f32 1e-05, %v1016_v51 }
 0x175   : > { %v1288_v34 = vmul.f32 %v1256_v31, %v2417_v56  ;;  %v889_v59 = vmul.f32 %v2773_v10, %v2773_v10  ;;  %v1289_v36 = vmul.f32 %v1257_v11, %v2421_v61  ;;  %v1308_v25 = vperm.slane %v2693_v44, 4 }
 0x176   : > { %v1155_v26 = vsel %vm1154_vm8, %v1815_v41, %v1151_v55  ;;  %v1307_v41 = vperm.slane %v2693_v44, 3  ;;  %1818 = vrsqrt.f32 %v2769_v12  ;;  %v1309_v0 = vperm.slane %v2693_v44, 5 }
 0x177   : > { %v1221_v28 = vrot.slane %v1155_v26, 5  ;;  %v995_v56 = vsel %vm2891_vm1, %v889_v59, 0.0  ;;  %v1336_v19 = vadd.f32 %v1304_v8, %v1284_v6  ;;  %v1337_v38 = vadd.f32 %v1305_v14, %v1285_v35 }
 0x178   : > { %v1338_v48 = vadd.f32 %v1306_v30, %v1286_v37  ;;  %v1371_v49 = vpack.c.bf16 %v1359_v23, %v1358_v1  ;;  %1820 = vrsqrt.f32 %v2778_v40  ;;  %v996_v29 = vrot.slane %v995_v56, 4 }
 0x179   : > { %v1240_v17 = vsel %vm2892_vm15, %v1220_v15, %v1221_v28  ;;  %v1339_v60 = vadd.f32 %v1307_v41, %v1287_v16  ;;  %v1340_v61 = vadd.f32 %v1308_v25, %v1288_v34  ;;  %v1341_v4 = vadd.f32 %v1309_v0, %v1289_v36 }
 0x17a   : > { %v2788_v45 = vsel %vm2891_vm1, %v1239_v47, %v1240_v17  ;;  %v1352_v63 = vmax.f32 %v1336_v19, 0.0  ;;  %v2794_v27 = vpop.eup %1816  ;;  %v997_v18 = vadd.f32 %v996_v29, %v995_v56  ;;  %v1353_v47 = vmax.f32 %v1337_v38, 0.0 }
 0x17b   : > { %v1354_v57 = vmax.f32 %v1338_v48, 0.0  ;;  %v1355_v58 = vmax.f32 %v1339_v60, 0.0  ;;  %v1356_v44 = vmax.f32 %v1340_v61, 0.0  ;;  %v1357_v3 = vmax.f32 %v1341_v4, 0.0 }
 0x17c   : > { %v2796_v62 = vpop.eup %1818  ;;  %v1389_v54 = vrot.slane %v1371_v49, 2  ;;  %v1390_v6 = vrot.slane %v1371_v49, 5  ;;  %v998_v35 = vrot.slane %v997_v18, 2  ;;  %v1368_v32 = vpack.c.bf16 %v1353_v47, %v1352_v63 }
 0x17d   : > { %v1369_v1 = vpack.c.bf16 %v1355_v58, %v1354_v57  ;;  %v1370_v20 = vpack.c.bf16 %v1357_v3, %v1356_v44  ;;  %v1157_v5 = vmul.f32 %v2794_v27, %v2762_v53  ;;  %v1167_v15 = vmul.f32 %v2796_v62, %v2769_v12 }
 0x17e   : > { %v1821_v2 = vpop.eup %1820  ;;  %v999_v7 = vadd.f32 %v998_v35, %v997_v18  ;;  %v1384_v13 = vrot.slane %v1368_v32, 3  ;;  %v1410_v16 = vsel %vm1233_vm0, %v1389_v54, %v1390_v6  ;;  %vm1163_vm9 = vweird.f32 %v2794_v27 }
 0x17f   : > { %v1385_v39 = vrot.slane %v1369_v1, 6  ;;  %v1386_v42 = vrot.slane %v1369_v1, 1  ;;  %v1387_v55 = vrot.slane %v1370_v20, 4  ;;  %v1388_v31 = vrot.slane %v1370_v20, 7 }
 0x180   : > { %v1000_v37 = vrot.slane %v999_v7, 1  ;;  %v1177_v51 = vmul.f32 %v1821_v2, %v2778_v40  ;;  %v1400_v22 = vsel %vm1226_vm6, %v1368_v32, %v1384_v13  ;;  %v1158_v14 = vmul.f32 %v2794_v27, %v1157_v5 }
 0x181   : > { %v1403_v11 = vsel %vm2892_vm15, %v1385_v39, %v1386_v42  ;;  %v1407_v8 = vsel %vm1231_vm14, %v1387_v55, %v1388_v31  ;;  %v1168_v34 = vmul.f32 %v2796_v62, %v1167_v15  ;;  %vm1162_vm10 = vweird.f32 %v2762_v53 }
 0x182   : > { %v1001_v23 = vadd.f32 %v1000_v37, %v999_v7  ;;  %v1404_v26 = vsel %vm2891_vm1, %v1400_v22, %v1403_v11  ;;  %v1411_v28 = vsel %vm1235_vm2, %v1407_v8, %v1410_v16  ;;  %v1178_v41 = vmul.f32 %v1821_v2, %v1177_v51  ;;  %vm1164_vm13 = vmor %vm1162_vm10, %vm1163_vm9 }
 0x183   : > { %v1412_v59 = vsel %vm1237_vm3, %v1404_v26, %v1411_v28  ;;  %v1159_v36 = vmul.f32 0.5, %v1158_v14  ;;  %v1169_v25 = vmul.f32 0.5, %v1168_v34  ;;  %vm1173_vm11 = vweird.f32 %v2796_v62 }
 0x184   : > { %v1017_v30 = vmul.f32 %v1001_v23, %v2359_v21  ;;  %1430 = vst [vmem:[%s2814_s3] sm:$0xff] %v1412_v59  ;;  %v1179_v0 = vmul.f32 0.5, %v1178_v41  ;;  %vm1183_vm12 = vweird.f32 %v1821_v2  ;;  %vm1172_vm4 = vweird.f32 %v2769_v12 }
 0x185   : > { %v1160_v56 = vsub.f32 1.5, %v1159_v36  ;;  %v1170_v19 = vsub.f32 1.5, %v1169_v25  ;;  %vm1174_vm5 = vmor %vm1172_vm4, %vm1173_vm11  ;;  %vm1182_vm7 = vweird.f32 %v2778_v40  ;;  %v1301_v40 = vld [vmem:[%s328_s9 + $0x8] sm:$0xff] }
 0x186   : > { %v1035_v17 = vadd.f32 1e-05, %v1017_v30  ;;  %v1180_v38 = vsub.f32 1.5, %v1179_v0  ;;  %vm1184_vm8 = vmor %vm1182_vm7, %vm1183_vm12  ;;  %v1318_v1 = vperm.slane %v1301_v40, 6  ;;  %v1312_v7 = vperm.slane %v1301_v40, 0 }
 0x187   : > { %v1161_v49 = vmul.f32 %v2794_v27, %v1160_v56  ;;  %v1171_v29 = vmul.f32 %v2796_v62, %v1170_v19  ;;  %v1313_v5 = vperm.slane %v1301_v40, 1  ;;  %v1314_v13 = vperm.slane %v1301_v40, 2 }
 0x188   : > { %1822 = vrsqrt.f32 %v1035_v17  ;;  %v1181_v60 = vmul.f32 %v1821_v2, %v1180_v38  ;;  %vm1192_vm15 = vweird.f32 %v1035_v17  ;;  %v1315_v39 = vperm.slane %v1301_v40, 3 }
 0x189   : > { %v1165_v63 = vsel %vm1164_vm13, %v2794_v27, %v1161_v49  ;;  %v1175_v53 = vsel %vm1174_vm5, %v2796_v62, %v1171_v29  ;;  %v1019_v27 = vld [vmem:[%s318_s10 + $0x8] sm:$0xff]  ;;  %v1316_v42 = vperm.slane %v1301_v40, 4  ;;  %v1317_v37 = vperm.slane %v1301_v40, 5 }
 0x18a   : > { %v1185_v18 = vsel %vm1184_vm8, %v1821_v2, %v1181_v60  ;;  %v1222_v58 = vrot.slane %v1165_v63, 4  ;;  %v1223_v44 = vrot.slane %v1175_v53, 3  ;;  %v1319_v2 = vperm.slane %v1301_v40, 7 }
 0x18b   : > { %v1224_v3 = vrot.slane %v1185_v18, 2 }
 0x18c   : > { %v1242_v6 = vsel %vm1231_vm14, %v1222_v58, %v1223_v44 }
 0x18e   : > { %v1823_v48 = vpop.eup %1822 }
 0x18f   : > { %v1187_v21 = vmul.f32 %v1823_v48, %v1035_v17  ;;  %vm1193_vm1 = vweird.f32 %v1823_v48 }
 0x190   : > { %vm1194_vm9 = vmor %vm1192_vm15, %vm1193_vm1  ;;  %vm2915_vm1 = vcmask 1042434   ;;  %vm2916_vm15 = vcmask 1041408  }
 0x191   : > { %v1188_v61 = vmul.f32 %v1823_v48, %v1187_v21 }
 0x193   : > { %v1189_v4 = vmul.f32 0.5, %v1188_v61 }
 0x195   : > { %v1190_v47 = vsub.f32 1.5, %v1189_v4 }
 0x197   : > { %v1191_v57 = vmul.f32 %v1823_v48, %v1190_v47 }
 0x199   : > { %v1195_v12 = vsel %vm1194_vm9, %v1823_v48, %v1191_v57 }
 0x19a   : > { %v1225_v54 = vrot.slane %v1195_v12, 1 }
 0x19c   : > { %v1243_v35 = vsel %vm1233_vm0, %v1224_v3, %v1225_v54 }
 0x19d   : > { %v1244_v62 = vsel %vm1235_vm2, %v1242_v6, %v1243_v35 }
 0x19e   : > { %v1245_v32 = vsel %vm1237_vm3, %v2788_v45, %v1244_v62 }
 0x19f   : > { %v1249_v20 = vmul.f32 %v1245_v32, %v1019_v27 }
 0x1a1   : > { %v1266_v55 = vperm.slane %v1249_v20, 6  ;;  %v1267_v31 = vperm.slane %v1249_v20, 7  ;;  %v1260_v16 = vperm.slane %v1249_v20, 0  ;;  %v1261_v15 = vperm.slane %v1249_v20, 1 }
 0x1a2   : > { %v1262_v51 = vperm.slane %v1249_v20, 2  ;;  %v1263_v22 = vperm.slane %v1249_v20, 3  ;;  %v1264_v11 = vperm.slane %v1249_v20, 4  ;;  %v1265_v23 = vperm.slane %v1249_v20, 5 }
 0x1a3   : > { %v1298_v26 = vmul.f32 %v1266_v55, %v2709_v46  ;;  %v1299_v45 = vmul.f32 %v1267_v31, %v2773_v10  ;;  %v1292_v8 = vmul.f32 %v1260_v16, %v2563_v50  ;;  %v1293_v28 = vmul.f32 %v1261_v15, %v2621_v43 }
 0x1a4   : > { %v1294_v14 = vmul.f32 %v1262_v51, %v2637_v9  ;;  %v1295_v30 = vmul.f32 %v1263_v22, %v2646_v33  ;;  %v1296_v34 = vmul.f32 %v1264_v11, %v2661_v52  ;;  %v1297_v41 = vmul.f32 %v1265_v23, %v2682_v24 }
 0x1a5   : > { %v1350_v17 = vadd.f32 %v1318_v1, %v1298_v26  ;;  %v1351_v59 = vadd.f32 %v1319_v2, %v1299_v45  ;;  %v1344_v36 = vadd.f32 %v1312_v7, %v1292_v8  ;;  %v1345_v25 = vadd.f32 %v1313_v5, %v1293_v28 }
 0x1a6   : > { %v1346_v46 = vadd.f32 %v1314_v13, %v1294_v14  ;;  %v1347_v0 = vadd.f32 %v1315_v39, %v1295_v30  ;;  %v1348_v56 = vadd.f32 %v1316_v42, %v1296_v34  ;;  %v1349_v10 = vadd.f32 %v1317_v37, %v1297_v41 }
 0x1a7   : > { %v1366_v50 = vmax.f32 %v1350_v17, 0.0  ;;  %v1367_v19 = vmax.f32 %v1351_v59, 0.0  ;;  %v1360_v43 = vmax.f32 %v1344_v36, 0.0  ;;  %v1361_v38 = vmax.f32 %v1345_v25, 0.0 }
 0x1a8   : > { %v1362_v9 = vmax.f32 %v1346_v46, 0.0  ;;  %v1363_v33 = vmax.f32 %v1347_v0, 0.0  ;;  %v1364_v48 = vmax.f32 %v1348_v56, 0.0  ;;  %v1365_v52 = vmax.f32 %v1349_v10, 0.0 }
 0x1a9   : > { %v1375_v21 = vpack.c.bf16 %v1367_v19, %v1366_v50  ;;  %v1372_v24 = vpack.c.bf16 %v1361_v38, %v1360_v43 }
 0x1aa   : > { %v1373_v49 = vpack.c.bf16 %v1363_v33, %v1362_v9  ;;  %v1374_v29 = vpack.c.bf16 %v1365_v52, %v1364_v48 }
 0x1ab   : > { %v1396_v60 = vrot.slane %v1375_v21, 2  ;;  %v1397_v61 = vrot.slane %v1375_v21, 5  ;;  %v1391_v4 = vrot.slane %v1372_v24, 3 }
 0x1ac   : > { %v1392_v63 = vrot.slane %v1373_v49, 6  ;;  %v1393_v53 = vrot.slane %v1373_v49, 1  ;;  %v1394_v18 = vrot.slane %v1374_v29, 4  ;;  %v1395_v47 = vrot.slane %v1374_v29, 7 }
 0x1ad   : > { %v1415_v57 = vsel %vm1226_vm6, %v1372_v24, %v1391_v4  ;;  %v1425_v58 = vsel %vm1233_vm0, %v1396_v60, %v1397_v61 }
 0x1ae   : > { %v1418_v44 = vsel %vm2915_vm1, %v1392_v63, %v1393_v53  ;;  %v1422_v3 = vsel %vm1231_vm14, %v1394_v18, %v1395_v47 }
 0x1af   : > { %v1419_v12 = vsel %vm2916_vm15, %v1415_v57, %v1418_v44  ;;  %v1426_v54 = vsel %vm1235_vm2, %v1422_v3, %v1425_v58 }
 0x1b0   : > { %v1427_v40 = vsel %vm1237_vm3, %v1419_v12, %v1426_v54 }
 0x1b1   : > { %1431 = vst [vmem:[%s2814_s3 + $0x8] sm:$0xff] %v1427_v40 }
 0x1b2   : > { %2001 = shalt.err (!%p1998_p12)
}
 0x1b3   : > { %1726 = dma.vmem_to_hbm [thread:$0]  (%p2195_p3), %s1446_s26, 256, %s1448_s28, %s1433_s29  }
 0x1b4 PF: > { %p1752_p13 = scmp.ge.s32.totalorder %s2048_s21, 2  ;;  %s1459_s6 = sand.u32 1, %s2036_s18  }
 0x1b5   : > { %s1460_s25 = scalar_lea.sflag [#allocation4], %s1459_s6 }
 0x1b6   : > { %p1746_p2 = pnand %p1752_p13, %p2199_p4 }
 0x1b8   : > { %p1747_p6 = pneg %p1746_p2 }
 0x1ba   : > { %2031 = dma.done.wait (%p1747_p6), %s1460_s25, 256  }
 0x1bb   : > { %2033 = vsyncadd (%p1747_p6), %s1460_s25, 4294967040  ;;  %s2917_s23 = sld [smem:[#allocation16_spill]]  ;;  %p22_p7 = scmp.ge.s32.totalorder %s2106_s22, 10  }
 0x1bc   : > { %s2918_s18 = smov %s2040_s19  ;;  %s2919_s19 = smov %s2044_s20 }
 0x1bd   : > { %s2921_s21 = smov %s2106_s22  ;;  %24 = sbr.rel (!%p22_p7) target bundleno = 12 (0xc), region = 125 }
 0x1c1   : > { %s2920_s20 = smov %s2917_s23 }
 0x1c2   :  { %1466 = vsyncpa [#allocation3], 1 }
 0x1c3   :  { %1468 = vsyncpa [#allocation3 + $0x1], 1 }
 0x1c4   :  { %1469 = vsyncpa [#allocation6], 1 }
 0x1c5   :  { %1471 = vsyncpa [#allocation6 + $0x1], 1 }
 0x1c6   :  { %1472 = vsyncpa [#allocation9], 1 }
 0x1c7   :  { %1474 = vsyncpa [#allocation9 + $0x1], 1 }
 0x1c8   :  { %1475 = vsyncpa [#allocation4], 1 }
 0x1c9   :  { %1477 = vsyncpa [#allocation4 + $0x1], 1 }

</bundles_post_ra>
